<compile_context>
chip_gen: v7x
topology: tpu7x:2x2x1
jax: 0.10.0
libtpu: 0.0.40
codegen_flags: <defaults>
</compile_context>

<pallas_src>
import functools
import math

import jax
import jax.numpy as jnp
from jax.experimental import pallas as pl
from jax.experimental.pallas import tpu as pltpu

# Model dims from the reference script: dims = [784, 10, [256, 128], 32]
X_DIM = 784
Y_DIM = 10
H_DIMS = [256, 128]
Z_DIM = 32
X_PAD = 896          # 7 * 128: lane-dense decoder output
KL_LANES = 128       # lane-dense KL output
LOG2PI = math.log(2.0 * math.pi)


def _round_up(n, m):
    return ((n + m - 1) // m) * m


def _softplus(x):
    # numerically-stable softplus, VPU/EUP friendly
    return jnp.maximum(x, 0.0) + jnp.log1p(jnp.exp(-jnp.abs(x)))


def dgm_kernel(
    x_ref, eps_ref, eyb_ref, dyb_ref,          # batch-tiled activations
    ew1x_ref, ew2_ref, eb2_ref,                # encoder trunk
    hw_ref, hb_ref,                            # fused mu|log_var head
    dw1z_ref, dw2_ref, db2_ref,                # decoder trunk
    dw3_ref, db3_ref,                          # decoder output (padded)
    xmu_ref, kl_ref,
):
    f32 = jnp.float32
    bf16 = jnp.bfloat16

    # ----- Encoder: q_phi(z | [x, y]) ; y-contribution + bias pre-folded -----
    h1 = jnp.dot(x_ref[...], ew1x_ref[...], preferred_element_type=f32) + eyb_ref[...]
    h1 = jnp.maximum(h1, 0.0)

    h2 = jnp.dot(h1.astype(bf16), ew2_ref[...], preferred_element_type=f32) + eb2_ref[...]
    h2 = jnp.maximum(h2, 0.0)

    # Fused heads: one (128, 64) matmul -> [mu | log_var_pre]
    heads = jnp.dot(h2.astype(bf16), hw_ref[...], preferred_element_type=f32) + hb_ref[...]
    z_mu = heads[:, :Z_DIM]
    z_log_var = _softplus(heads[:, Z_DIM:])

    # ----- Sample (reparametrization trick) -----
    eps = eps_ref[...]
    z = z_mu + jnp.exp(0.5 * z_log_var) * eps

    # ----- KL (single-sample MC estimate log q(z|x) - log p(z), p = N(0, I)).
    # Exact simplification: (z - mu)^2 / (2 exp(lv)) == eps^2 / 2 and the
    # -0.5*log(2*pi) terms cancel, giving 0.5*sum(z^2 - eps^2 - lv).
    kl = 0.5 * jnp.sum(z * z - eps * eps - z_log_var, axis=-1, keepdims=True)
    kl_ref[...] = jnp.broadcast_to(kl, kl_ref.shape)   # lane-dense store

    # ----- Decoder: p_theta(x | [z, y]) ; y-contribution + bias pre-folded -----
    d1 = jnp.dot(z.astype(bf16), dw1z_ref[...], preferred_element_type=f32) + dyb_ref[...]
    d1 = jnp.maximum(d1, 0.0)

    d2 = jnp.dot(d1.astype(bf16), dw2_ref[...], preferred_element_type=f32) + db2_ref[...]
    d2 = jnp.maximum(d2, 0.0)

    logits = jnp.dot(d2.astype(bf16), dw3_ref[...], preferred_element_type=f32) + db3_ref[...]
    # sigmoid = 1 / (1 + exp(-x)); approx reciprocal runs on the EUP slot.
    sig = pl.reciprocal(1.0 + jnp.exp(-logits), approx=True)
    xmu_ref[...] = jnp.clip(sig, 0.0, 1.0)


# ----------------------------------------------------------------------------
# Parameter init (matches the PyTorch module: xavier_normal weights, zero bias)
# ----------------------------------------------------------------------------
def _xavier_normal(key, fan_in, fan_out):
    std = math.sqrt(2.0 / (fan_in + fan_out))
    # stored as (in, out) so the kernel computes act @ W
    return jax.random.normal(key, (fan_in, fan_out), dtype=jnp.float32) * std


def init_params(key):
    ks = jax.random.split(key, 8)
    params = {}
    # Encoder: (x_dim + y_dim) -> 256 -> 128 ; heads -> z_dim
    enc_w1 = _xavier_normal(ks[0], X_DIM + Y_DIM, H_DIMS[0])
    params["ew1x"] = enc_w1[:X_DIM]
    params["ew1y"] = enc_w1[X_DIM:]
    params["eb1"] = jnp.zeros((1, H_DIMS[0]), jnp.float32)
    params["ew2"] = _xavier_normal(ks[1], H_DIMS[0], H_DIMS[1])
    params["eb2"] = jnp.zeros((1, H_DIMS[1]), jnp.float32)
    params["muw"] = _xavier_normal(ks[2], H_DIMS[1], Z_DIM)
    params["mub"] = jnp.zeros((1, Z_DIM), jnp.float32)
    params["lvw"] = _xavier_normal(ks[3], H_DIMS[1], Z_DIM)
    params["lvb"] = jnp.zeros((1, Z_DIM), jnp.float32)
    # Decoder: (z_dim + y_dim) -> 128 -> 256 -> x_dim  (reversed h_dim)
    dec_w1 = _xavier_normal(ks[4], Z_DIM + Y_DIM, H_DIMS[1])
    params["dw1z"] = dec_w1[:Z_DIM]
    params["dw1y"] = dec_w1[Z_DIM:]
    params["db1"] = jnp.zeros((1, H_DIMS[1]), jnp.float32)
    params["dw2"] = _xavier_normal(ks[5], H_DIMS[1], H_DIMS[0])
    params["db2"] = jnp.zeros((1, H_DIMS[0]), jnp.float32)
    params["dw3"] = _xavier_normal(ks[6], H_DIMS[0], X_DIM)
    params["db3"] = jnp.zeros((1, X_DIM), jnp.float32)
    # TODO(synk): the Classifier head exists in __init__ but is unused in
    # forward(); it is not part of this kernel.
    return params


def prepare_params(params):
    """One-time layout prep: bf16 weights, fused heads, padded output layer,
    and per-label tables with the first-layer biases folded in."""
    bf16 = jnp.bfloat16
    return {
        "ew1x": params["ew1x"].astype(bf16),
        "ew2": params["ew2"].astype(bf16),
        "eb2": params["eb2"],
        "hw": jnp.concatenate([params["muw"], params["lvw"]], axis=1).astype(bf16),
        "hb": jnp.concatenate([params["mub"], params["lvb"]], axis=1),
        "dw1z": params["dw1z"].astype(bf16),
        "dw2": params["dw2"].astype(bf16),
        "db2": params["db2"],
        "dw3": jnp.pad(params["dw3"], ((0, 0), (0, X_PAD - X_DIM))).astype(bf16),
        "db3": jnp.pad(params["db3"], ((0, 0), (0, X_PAD - X_DIM))),
        # one-hot y sums to 1, so y @ (W_y + b) == W_y[label] + b
        "enc_ytab": params["ew1y"] + params["eb1"],   # (10, 256) f32
        "dec_ytab": params["dw1y"] + params["db1"],   # (10, 128) f32
    }


# ----------------------------------------------------------------------------
# Forward wrapper
# ----------------------------------------------------------------------------
@functools.partial(jax.jit, static_argnames=("tb",))
def dgm_forward(x, y, eps, prep, tb=256):
    """Returns (x_mu [B, X_DIM], kl_divergence [B])."""
    b = x.shape[0]
    tb = min(tb, _round_up(b, 8))
    grid = (pl.cdiv(b, tb),)

    # Fold the one-hot label contribution (+ first-layer bias) into tiny
    # per-row biases; removes two MXU passes from the kernel.
    enc_yb = jnp.dot(y, prep["enc_ytab"])   # (B, 256) f32
    dec_yb = jnp.dot(y, prep["dec_ytab"])   # (B, 128) f32
    x_bf = x.astype(jnp.bfloat16)

    bmap = lambda i: (i, 0)   # batch-tiled
    wmap = lambda i: (0, 0)   # VMEM-resident weights

    in_specs = [
        pl.BlockSpec((tb, X_DIM), bmap),              # x (bf16)
        pl.BlockSpec((tb, Z_DIM), bmap),              # eps
        pl.BlockSpec((tb, H_DIMS[0]), bmap),          # encoder y-bias
        pl.BlockSpec((tb, H_DIMS[1]), bmap),          # decoder y-bias
        pl.BlockSpec((X_DIM, H_DIMS[0]), wmap),       # ew1x
        pl.BlockSpec((H_DIMS[0], H_DIMS[1]), wmap),   # ew2
        pl.BlockSpec((1, H_DIMS[1]), wmap),           # eb2
        pl.BlockSpec((H_DIMS[1], 2 * Z_DIM), wmap),   # fused head W
        pl.BlockSpec((1, 2 * Z_DIM), wmap),           # fused head b
        pl.BlockSpec((Z_DIM, H_DIMS[1]), wmap),       # dw1z
        pl.BlockSpec((H_DIMS[1], H_DIMS[0]), wmap),   # dw2
        pl.BlockSpec((1, H_DIMS[0]), wmap),           # db2
        pl.BlockSpec((H_DIMS[0], X_PAD), wmap),       # dw3 (padded)
        pl.BlockSpec((1, X_PAD), wmap),               # db3 (padded)
    ]
    out_specs = (
        pl.BlockSpec((tb, X_PAD), bmap),
        pl.BlockSpec((tb, KL_LANES), bmap),
    )

    xmu_pad, kl = pl.pallas_call(
        dgm_kernel,
        grid=grid,
        out_shape=(
            jax.ShapeDtypeStruct((b, X_PAD), jnp.float32),
            jax.ShapeDtypeStruct((b, KL_LANES), jnp.float32),
        ),
        in_specs=in_specs,
        out_specs=out_specs,
        compiler_params=pltpu.CompilerParams(
            dimension_semantics=("parallel",),
            vmem_limit_bytes=32 << 20,
        ),
    )(x_bf, eps, enc_yb, dec_yb,
      prep["ew1x"], prep["ew2"], prep["eb2"],
      prep["hw"], prep["hb"],
      prep["dw1z"], prep["dw2"], prep["db2"],
      prep["dw3"], prep["db3"])

    return xmu_pad[:, :X_DIM], kl[:, 0]


# ----------------------------------------------------------------------------
# Pure-JAX reference (same bf16 matmul precision) for validation
# ----------------------------------------------------------------------------
def dgm_reference(x, y, eps, prep):
    f32, bf16 = jnp.float32, jnp.bfloat16
    eyb = jnp.dot(y, prep["enc_ytab"])
    dyb = jnp.dot(y, prep["dec_ytab"])
    xb = x.astype(bf16)
    h1 = jnp.maximum(jnp.dot(xb, prep["ew1x"], preferred_element_type=f32) + eyb, 0.0)
    h2 = jnp.maximum(jnp.dot(h1.astype(bf16), prep["ew2"], preferred_element_type=f32) + prep["eb2"], 0.0)
    heads = jnp.dot(h2.astype(bf16), prep["hw"], preferred_element_type=f32) + prep["hb"]
    z_mu = heads[:, :Z_DIM]
    z_log_var = jax.nn.softplus(heads[:, Z_DIM:])
    z = z_mu + jnp.exp(0.5 * z_log_var) * eps

    def log_gaussian(v, mu, log_var):
        return jnp.sum(-0.5 * LOG2PI - log_var / 2.0
                       - (v - mu) ** 2 / (2.0 * jnp.exp(log_var)), axis=-1)

    kl = log_gaussian(z, z_mu, z_log_var) - log_gaussian(z, 0.0, 0.0)
    d1 = jnp.maximum(jnp.dot(z.astype(bf16), prep["dw1z"], preferred_element_type=f32) + dyb, 0.0)
    d2 = jnp.maximum(jnp.dot(d1.astype(bf16), prep["dw2"], preferred_element_type=f32) + prep["db2"], 0.0)
    logits = jnp.dot(d2.astype(bf16), prep["dw3"], preferred_element_type=f32) + prep["db3"]
    return jax.nn.sigmoid(logits)[:, :X_DIM], kl


if __name__ == "__main__":
    key = jax.random.PRNGKey(0)
    k_param, k_x, k_y, k_eps = jax.random.split(key, 4)

    B = 32
    TB = 16   # small tile so the demo exercises a 2-step grid
    params = init_params(k_param)
    prep = prepare_params(params)

    x = jax.random.normal(k_x, (B, X_DIM), dtype=jnp.float32)
    labels = jax.random.randint(k_y, (B,), 0, Y_DIM)
    y = jax.nn.one_hot(labels, Y_DIM, dtype=jnp.float32)
    # reparametrization noise (torch.randn in the PyTorch Sample module)
    eps = jax.random.normal(k_eps, (B, Z_DIM), dtype=jnp.float32)

    x_mu, kl = jax.block_until_ready(dgm_forward(x, y, eps, prep, tb=TB))

    assert x_mu.shape == (B, X_DIM) and kl.shape == (B,)
    assert bool(jnp.all(jnp.isfinite(x_mu))) and bool(jnp.all(jnp.isfinite(kl)))
    assert bool(jnp.all(x_mu >= 0.0)) and bool(jnp.all(x_mu <= 1.0))

    # Validate against a same-precision pure-JAX reference.
    x_mu_ref, kl_ref = dgm_reference(x, y, eps, prep)
    assert float(jnp.max(jnp.abs(x_mu - x_mu_ref))) < 2e-2
    assert float(jnp.max(jnp.abs(kl - kl_ref) / (jnp.abs(kl_ref) + 1.0))) < 5e-2

    print("KERNEL_OK")
</pallas_src>

<mosaic_0001>
module attributes {stable_mosaic.version = 11 : i64} {
  func.func @dgm_kernel(%arg0: i32, %arg1: memref<16x784xbf16, #tpu.memory_space<vmem>>, %arg2: memref<16x32xf32, #tpu.memory_space<vmem>>, %arg3: memref<16x256xf32, #tpu.memory_space<vmem>>, %arg4: memref<16x128xf32, #tpu.memory_space<vmem>>, %arg5: memref<784x256xbf16, #tpu.memory_space<vmem>>, %arg6: memref<256x128xbf16, #tpu.memory_space<vmem>>, %arg7: memref<1x128xf32, #tpu.memory_space<vmem>>, %arg8: memref<128x64xbf16, #tpu.memory_space<vmem>>, %arg9: memref<1x64xf32, #tpu.memory_space<vmem>>, %arg10: memref<32x128xbf16, #tpu.memory_space<vmem>>, %arg11: memref<128x256xbf16, #tpu.memory_space<vmem>>, %arg12: memref<1x256xf32, #tpu.memory_space<vmem>>, %arg13: memref<256x896xbf16, #tpu.memory_space<vmem>>, %arg14: memref<1x896xf32, #tpu.memory_space<vmem>>, %arg15: memref<16x896xf32, #tpu.memory_space<vmem>>, %arg16: memref<16x128xf32, #tpu.memory_space<vmem>>) attributes {dimension_semantics = [#tpu.dimension_semantics<parallel>], iteration_bounds = array<i64: 2>, scalar_prefetch = 0 : i64, scratch_operands = 0 : i64, tpu.core_type = #tpu.core_type<tc>, window_params = [{transform_indices = @transform_0, window_bounds = array<i64: 16, 784>}, {transform_indices = @transform_1, window_bounds = array<i64: 16, 32>}, {transform_indices = @transform_2, window_bounds = array<i64: 16, 256>}, {transform_indices = @transform_3, window_bounds = array<i64: 16, 128>}, {pipeline_mode = #tpu.pipeline_mode<synchronous>, transform_indices = @transform_4, window_bounds = array<i64: 784, 256>}, {pipeline_mode = #tpu.pipeline_mode<synchronous>, transform_indices = @transform_5, window_bounds = array<i64: 256, 128>}, {pipeline_mode = #tpu.pipeline_mode<synchronous>, transform_indices = @transform_6, window_bounds = array<i64: 1, 128>}, {pipeline_mode = #tpu.pipeline_mode<synchronous>, transform_indices = @transform_7, window_bounds = array<i64: 128, 64>}, {pipeline_mode = #tpu.pipeline_mode<synchronous>, transform_indices = @transform_8, window_bounds = array<i64: 1, 64>}, {pipeline_mode = #tpu.pipeline_mode<synchronous>, transform_indices = @transform_9, window_bounds = array<i64: 32, 128>}, {pipeline_mode = #tpu.pipeline_mode<synchronous>, transform_indices = @transform_10, window_bounds = array<i64: 128, 256>}, {pipeline_mode = #tpu.pipeline_mode<synchronous>, transform_indices = @transform_11, window_bounds = array<i64: 1, 256>}, {pipeline_mode = #tpu.pipeline_mode<synchronous>, transform_indices = @transform_12, window_bounds = array<i64: 256, 896>}, {pipeline_mode = #tpu.pipeline_mode<synchronous>, transform_indices = @transform_13, window_bounds = array<i64: 1, 896>}, {transform_indices = @transform_14, window_bounds = array<i64: 16, 896>}, {transform_indices = @transform_15, window_bounds = array<i64: 16, 128>}]} {
    %c0 = arith.constant 0 : index
    %c0_0 = arith.constant 0 : index
    %0 = vector.load %arg1[%c0, %c0_0] : memref<16x784xbf16, #tpu.memory_space<vmem>>, vector<16x784xbf16>
    %c0_1 = arith.constant 0 : index
    %c0_2 = arith.constant 0 : index
    %1 = vector.load %arg5[%c0_1, %c0_2] : memref<784x256xbf16, #tpu.memory_space<vmem>>, vector<784x256xbf16>
    %cst = arith.constant dense<0.000000e+00> : vector<16x256xf32>
    %2 = tpu.matmul %0, %1, %cst {dimension_numbers = #tpu.dot_dimension_numbers<[1], [0], [0], [1], [0, 0, 1, 1], [], []>} : vector<16x784xbf16>, vector<784x256xbf16>, vector<16x256xf32> -> vector<16x256xf32>
    %c0_3 = arith.constant 0 : index
    %c0_4 = arith.constant 0 : index
    %3 = vector.load %arg3[%c0_3, %c0_4] : memref<16x256xf32, #tpu.memory_space<vmem>>, vector<16x256xf32>
    %4 = arith.addf %2, %3 : vector<16x256xf32>
    %cst_5 = arith.constant 0.000000e+00 : f32
    %5 = vector.broadcast %cst_5 : f32 to vector<16x256xf32>
    %6 = arith.maximumf %4, %5 : vector<16x256xf32>
    %7 = arith.truncf %6 : vector<16x256xf32> to vector<16x256xbf16>
    %c0_6 = arith.constant 0 : index
    %c0_7 = arith.constant 0 : index
    %8 = vector.load %arg6[%c0_6, %c0_7] : memref<256x128xbf16, #tpu.memory_space<vmem>>, vector<256x128xbf16>
    %cst_8 = arith.constant dense<0.000000e+00> : vector<16x128xf32>
    %9 = tpu.matmul %7, %8, %cst_8 {dimension_numbers = #tpu.dot_dimension_numbers<[1], [0], [0], [1], [0, 0, 1, 1], [], []>} : vector<16x256xbf16>, vector<256x128xbf16>, vector<16x128xf32> -> vector<16x128xf32>
    %c0_9 = arith.constant 0 : index
    %c0_10 = arith.constant 0 : index
    %10 = vector.load %arg7[%c0_9, %c0_10] : memref<1x128xf32, #tpu.memory_space<vmem>>, vector<1x128xf32>
    %11 = vector.broadcast %10 : vector<1x128xf32> to vector<16x128xf32>
    %12 = arith.addf %9, %11 : vector<16x128xf32>
    %cst_11 = arith.constant 0.000000e+00 : f32
    %13 = vector.broadcast %cst_11 : f32 to vector<16x128xf32>
    %14 = arith.maximumf %12, %13 : vector<16x128xf32>
    %15 = arith.truncf %14 : vector<16x128xf32> to vector<16x128xbf16>
    %c0_12 = arith.constant 0 : index
    %c0_13 = arith.constant 0 : index
    %16 = vector.load %arg8[%c0_12, %c0_13] : memref<128x64xbf16, #tpu.memory_space<vmem>>, vector<128x64xbf16>
    %cst_14 = arith.constant dense<0.000000e+00> : vector<16x64xf32>
    %17 = tpu.matmul %15, %16, %cst_14 {dimension_numbers = #tpu.dot_dimension_numbers<[1], [0], [0], [1], [0, 0, 1, 1], [], []>} : vector<16x128xbf16>, vector<128x64xbf16>, vector<16x64xf32> -> vector<16x64xf32>
    %c0_15 = arith.constant 0 : index
    %c0_16 = arith.constant 0 : index
    %18 = vector.load %arg9[%c0_15, %c0_16] : memref<1x64xf32, #tpu.memory_space<vmem>>, vector<1x64xf32>
    %19 = vector.broadcast %18 : vector<1x64xf32> to vector<16x64xf32>
    %20 = arith.addf %17, %19 : vector<16x64xf32>
    %21 = vector.extract_strided_slice %20 {offsets = [0, 0], sizes = [16, 32], strides = [1, 1]} : vector<16x64xf32> to vector<16x32xf32>
    %22 = vector.extract_strided_slice %20 {offsets = [0, 32], sizes = [16, 32], strides = [1, 1]} : vector<16x64xf32> to vector<16x32xf32>
    %cst_17 = arith.constant 0.000000e+00 : f32
    %23 = vector.broadcast %cst_17 : f32 to vector<16x32xf32>
    %24 = arith.maximumf %22, %23 : vector<16x32xf32>
    %25 = math.absf %22 : vector<16x32xf32>
    %cst_18 = arith.constant 0.000000e+00 : f32
    %26 = vector.broadcast %cst_18 : f32 to vector<16x32xf32>
    %27 = arith.subf %26, %25 : vector<16x32xf32>
    %28 = math.exp %27 : vector<16x32xf32>
    %29 = math.log1p %28 : vector<16x32xf32>
    %30 = arith.addf %24, %29 : vector<16x32xf32>
    %c0_19 = arith.constant 0 : index
    %c0_20 = arith.constant 0 : index
    %31 = vector.load %arg2[%c0_19, %c0_20] : memref<16x32xf32, #tpu.memory_space<vmem>>, vector<16x32xf32>
    %cst_21 = arith.constant 5.000000e-01 : f32
    %32 = vector.broadcast %cst_21 : f32 to vector<16x32xf32>
    %33 = arith.mulf %32, %30 : vector<16x32xf32>
    %34 = math.exp %33 : vector<16x32xf32>
    %35 = arith.mulf %34, %31 : vector<16x32xf32>
    %36 = arith.addf %21, %35 : vector<16x32xf32>
    %37 = arith.mulf %36, %36 : vector<16x32xf32>
    %38 = arith.mulf %31, %31 : vector<16x32xf32>
    %39 = arith.subf %37, %38 : vector<16x32xf32>
    %40 = arith.subf %39, %30 : vector<16x32xf32>
    %cst_22 = arith.constant dense<0.000000e+00> : vector<16xf32>
    %41 = vector.multi_reduction <add>, %40, %cst_22 [1] : vector<16x32xf32> to vector<16xf32>
    %42 = vector.shape_cast %41 : vector<16xf32> to vector<16x1xf32>
    %cst_23 = arith.constant 5.000000e-01 : f32
    %43 = vector.broadcast %cst_23 : f32 to vector<16x1xf32>
    %44 = arith.mulf %43, %42 : vector<16x1xf32>
    %45 = vector.shape_cast %44 : vector<16x1xf32> to vector<16x1xf32>
    %46 = vector.broadcast %45 : vector<16x1xf32> to vector<16x128xf32>
    %c0_24 = arith.constant 0 : index
    %c0_25 = arith.constant 0 : index
    %47 = vector.load %arg16[%c0_24, %c0_25] : memref<16x128xf32, #tpu.memory_space<vmem>>, vector<16x128xf32>
    tpu.vector_store %arg16[%c0_24, %c0_25], %46 {strides = array<i32>} : memref<16x128xf32, #tpu.memory_space<vmem>>, vector<16x128xf32>,
    %48 = arith.truncf %36 : vector<16x32xf32> to vector<16x32xbf16>
    %c0_26 = arith.constant 0 : index
    %c0_27 = arith.constant 0 : index
    %49 = vector.load %arg10[%c0_26, %c0_27] : memref<32x128xbf16, #tpu.memory_space<vmem>>, vector<32x128xbf16>
    %cst_28 = arith.constant dense<0.000000e+00> : vector<16x128xf32>
    %50 = tpu.matmul %48, %49, %cst_28 {dimension_numbers = #tpu.dot_dimension_numbers<[1], [0], [0], [1], [0, 0, 1, 1], [], []>} : vector<16x32xbf16>, vector<32x128xbf16>, vector<16x128xf32> -> vector<16x128xf32>
    %c0_29 = arith.constant 0 : index
    %c0_30 = arith.constant 0 : index
    %51 = vector.load %arg4[%c0_29, %c0_30] : memref<16x128xf32, #tpu.memory_space<vmem>>, vector<16x128xf32>
    %52 = arith.addf %50, %51 : vector<16x128xf32>
    %cst_31 = arith.constant 0.000000e+00 : f32
    %53 = vector.broadcast %cst_31 : f32 to vector<16x128xf32>
    %54 = arith.maximumf %52, %53 : vector<16x128xf32>
    %55 = arith.truncf %54 : vector<16x128xf32> to vector<16x128xbf16>
    %c0_32 = arith.constant 0 : index
    %c0_33 = arith.constant 0 : index
    %56 = vector.load %arg11[%c0_32, %c0_33] : memref<128x256xbf16, #tpu.memory_space<vmem>>, vector<128x256xbf16>
    %cst_34 = arith.constant dense<0.000000e+00> : vector<16x256xf32>
    %57 = tpu.matmul %55, %56, %cst_34 {dimension_numbers = #tpu.dot_dimension_numbers<[1], [0], [0], [1], [0, 0, 1, 1], [], []>} : vector<16x128xbf16>, vector<128x256xbf16>, vector<16x256xf32> -> vector<16x256xf32>
    %c0_35 = arith.constant 0 : index
    %c0_36 = arith.constant 0 : index
    %58 = vector.load %arg12[%c0_35, %c0_36] : memref<1x256xf32, #tpu.memory_space<vmem>>, vector<1x256xf32>
    %59 = vector.broadcast %58 : vector<1x256xf32> to vector<16x256xf32>
    %60 = arith.addf %57, %59 : vector<16x256xf32>
    %cst_37 = arith.constant 0.000000e+00 : f32
    %61 = vector.broadcast %cst_37 : f32 to vector<16x256xf32>
    %62 = arith.maximumf %60, %61 : vector<16x256xf32>
    %63 = arith.truncf %62 : vector<16x256xf32> to vector<16x256xbf16>
    %c0_38 = arith.constant 0 : index
    %c0_39 = arith.constant 0 : index
    %64 = vector.load %arg13[%c0_38, %c0_39] : memref<256x896xbf16, #tpu.memory_space<vmem>>, vector<256x896xbf16>
    %cst_40 = arith.constant dense<0.000000e+00> : vector<16x896xf32>
    %65 = tpu.matmul %63, %64, %cst_40 {dimension_numbers = #tpu.dot_dimension_numbers<[1], [0], [0], [1], [0, 0, 1, 1], [], []>} : vector<16x256xbf16>, vector<256x896xbf16>, vector<16x896xf32> -> vector<16x896xf32>
    %c0_41 = arith.constant 0 : index
    %c0_42 = arith.constant 0 : index
    %66 = vector.load %arg14[%c0_41, %c0_42] : memref<1x896xf32, #tpu.memory_space<vmem>>, vector<1x896xf32>
    %67 = vector.broadcast %66 : vector<1x896xf32> to vector<16x896xf32>
    %68 = arith.addf %65, %67 : vector<16x896xf32>
    %cst_43 = arith.constant 0.000000e+00 : f32
    %69 = vector.broadcast %cst_43 : f32 to vector<16x896xf32>
    %70 = arith.subf %69, %68 : vector<16x896xf32>
    %71 = math.exp %70 : vector<16x896xf32>
    %cst_44 = arith.constant 1.000000e+00 : f32
    %72 = vector.broadcast %cst_44 : f32 to vector<16x896xf32>
    %73 = arith.addf %72, %71 : vector<16x896xf32>
    %74 = tpu.reciprocal %73 {approx = true} : vector<16x896xf32> -> vector<16x896xf32>
    %cst_45 = arith.constant 0.000000e+00 : f32
    %cst_46 = arith.constant 1.000000e+00 : f32
    %75 = vector.broadcast %cst_45 : f32 to vector<16x896xf32>
    %76 = arith.maximumf %75, %74 : vector<16x896xf32>
    %77 = vector.broadcast %cst_46 : f32 to vector<16x896xf32>
    %78 = arith.minimumf %77, %76 : vector<16x896xf32>
    %c0_47 = arith.constant 0 : index
    %c0_48 = arith.constant 0 : index
    %79 = vector.load %arg15[%c0_47, %c0_48] : memref<16x896xf32, #tpu.memory_space<vmem>>, vector<16x896xf32>
    tpu.vector_store %arg15[%c0_47, %c0_48], %78 {strides = array<i32>} : memref<16x896xf32, #tpu.memory_space<vmem>>, vector<16x896xf32>,
    return
  }
  func.func @transform_0(%arg0: i32) -> (i32, i32) {
    %c0_i32 = arith.constant 0 : i32
    %c0_i32_0 = arith.constant 0 : i32
    return %arg0, %c0_i32 : i32, i32
  }
  func.func @transform_1(%arg0: i32) -> (i32, i32) {
    %c0_i32 = arith.constant 0 : i32
    %c0_i32_0 = arith.constant 0 : i32
    return %arg0, %c0_i32 : i32, i32
  }
  func.func @transform_2(%arg0: i32) -> (i32, i32) {
    %c0_i32 = arith.constant 0 : i32
    %c0_i32_0 = arith.constant 0 : i32
    return %arg0, %c0_i32 : i32, i32
  }
  func.func @transform_3(%arg0: i32) -> (i32, i32) {
    %c0_i32 = arith.constant 0 : i32
    %c0_i32_0 = arith.constant 0 : i32
    return %arg0, %c0_i32 : i32, i32
  }
  func.func @transform_4(%arg0: i32) -> (i32, i32) {
    %c0_i32 = arith.constant 0 : i32
    %c0_i32_0 = arith.constant 0 : i32
    %c0_i32_1 = arith.constant 0 : i32
    return %c0_i32, %c0_i32_0 : i32, i32
  }
  func.func @transform_5(%arg0: i32) -> (i32, i32) {
    %c0_i32 = arith.constant 0 : i32
    %c0_i32_0 = arith.constant 0 : i32
    %c0_i32_1 = arith.constant 0 : i32
    return %c0_i32, %c0_i32_0 : i32, i32
  }
  func.func @transform_6(%arg0: i32) -> (i32, i32) {
    %c0_i32 = arith.constant 0 : i32
    %c0_i32_0 = arith.constant 0 : i32
    %c0_i32_1 = arith.constant 0 : i32
    return %c0_i32, %c0_i32_0 : i32, i32
  }
  func.func @transform_7(%arg0: i32) -> (i32, i32) {
    %c0_i32 = arith.constant 0 : i32
    %c0_i32_0 = arith.constant 0 : i32
    %c0_i32_1 = arith.constant 0 : i32
    return %c0_i32, %c0_i32_0 : i32, i32
  }
  func.func @transform_8(%arg0: i32) -> (i32, i32) {
    %c0_i32 = arith.constant 0 : i32
    %c0_i32_0 = arith.constant 0 : i32
    %c0_i32_1 = arith.constant 0 : i32
    return %c0_i32, %c0_i32_0 : i32, i32
  }
  func.func @transform_9(%arg0: i32) -> (i32, i32) {
    %c0_i32 = arith.constant 0 : i32
    %c0_i32_0 = arith.constant 0 : i32
    %c0_i32_1 = arith.constant 0 : i32
    return %c0_i32, %c0_i32_0 : i32, i32
  }
  func.func @transform_10(%arg0: i32) -> (i32, i32) {
    %c0_i32 = arith.constant 0 : i32
    %c0_i32_0 = arith.constant 0 : i32
    %c0_i32_1 = arith.constant 0 : i32
    return %c0_i32, %c0_i32_0 : i32, i32
  }
  func.func @transform_11(%arg0: i32) -> (i32, i32) {
    %c0_i32 = arith.constant 0 : i32
    %c0_i32_0 = arith.constant 0 : i32
    %c0_i32_1 = arith.constant 0 : i32
    return %c0_i32, %c0_i32_0 : i32, i32
  }
  func.func @transform_12(%arg0: i32) -> (i32, i32) {
    %c0_i32 = arith.constant 0 : i32
    %c0_i32_0 = arith.constant 0 : i32
    %c0_i32_1 = arith.constant 0 : i32
    return %c0_i32, %c0_i32_0 : i32, i32
  }
  func.func @transform_13(%arg0: i32) -> (i32, i32) {
    %c0_i32 = arith.constant 0 : i32
    %c0_i32_0 = arith.constant 0 : i32
    %c0_i32_1 = arith.constant 0 : i32
    return %c0_i32, %c0_i32_0 : i32, i32
  }
  func.func @transform_14(%arg0: i32) -> (i32, i32) {
    %c0_i32 = arith.constant 0 : i32
    %c0_i32_0 = arith.constant 0 : i32
    return %arg0, %c0_i32 : i32, i32
  }
  func.func @transform_15(%arg0: i32) -> (i32, i32) {
    %c0_i32 = arith.constant 0 : i32
    %c0_i32_0 = arith.constant 0 : i32
    return %arg0, %c0_i32 : i32, i32
  }
}

</mosaic_0001>

<bundles_post_ra>
// kernel: dgm_forward.1
= control target key start
LH: loop header
LB: loop body
LE: loop exit
PB: predicated region body
PF: predicated region fallthrough
CT: control target
= control target key end

     0   :  { %s4778_s0 = inlined_call_operand.vmem [shape: bf16[32,784], index: 0, kind: input, shape index: {}]   ;;  %s4779_s1 = inlined_call_operand.vmem [shape: f32[32,32], index: 1, kind: input, shape index: {}]   ;;  %s4780_s2 = inlined_call_operand.vmem [shape: f32[32,256], index: 2, kind: input, shape index: {}]   ;;  %s4781_s3 = inlined_call_operand.vmem [shape: f32[32,128], index: 3, kind: input, shape index: {}]   ;;  %s4782_s4 = inlined_call_operand.hbm [shape: bf16[784,256], index: 4, kind: input, shape index: {}]   ;;  %s4783_s5 = inlined_call_operand.vmem [shape: bf16[256,128], index: 5, kind: input, shape index: {}]   ;;  %s4784_s6 = inlined_call_operand.vmem [shape: f32[1,128], index: 6, kind: input, shape index: {}]   ;;  %s4785_s7 = inlined_call_operand.vmem [shape: bf16[128,64], index: 7, kind: input, shape index: {}]   ;;  %s4786_s8 = inlined_call_operand.vmem [shape: f32[1,64], index: 8, kind: input, shape index: {}]   ;;  %s4787_s9 = inlined_call_operand.vmem [shape: bf16[32,128], index: 9, kind: input, shape index: {}]   ;;  %s4788_s10 = inlined_call_operand.vmem [shape: bf16[128,256], index: 10, kind: input, shape index: {}]   ;;  %s4789_s11 = inlined_call_operand.vmem [shape: f32[1,256], index: 11, kind: input, shape index: {}]   ;;  %s4790_s12 = inlined_call_operand.hbm [shape: bf16[256,896], index: 12, kind: input, shape index: {}]   ;;  %s4791_s13 = inlined_call_operand.vmem [shape: f32[1,896], index: 13, kind: input, shape index: {}]   ;;  %s4792_s14 = inlined_call_operand.hbm [shape: f32[32,896], index: 14, kind: output, shape index: {0}]   ;;  %s4793_s15 = inlined_call_operand.vmem [shape: f32[32,128], index: 15, kind: output, shape index: {1}]  }
   0x1   :  { %4808 = sst [smem:[#allocation19_spill]] %s4792_s14 }
   0x2   :  { %21 = vsyncpa [#allocation3], 0 }
   0x3   :  { %22 = vsyncpa [#allocation6], 0 }
   0x4   :  { %23 = vsyncpa [#allocation4], 0 }
   0x5   :  { %25 = vsyncpa [#allocation4 + $0x1], 0  ;;  %s4340_s18 = smov 0   ;;  %s4342_s19 = smov 0  }
   0x6   :  { %s4344_s20 = smov 0   ;;  %s4346_s21 = smov 0  }
   0x7 LB: > { %4809 = sst [smem:[#allocation11_spill]] %s4232_s18  ;;  %s4361_s22 = sadd.s32 4294967295, %s4244_s21   ;;  %s4244_s21 = sphi %s4346_s21, %s4834_s21   ;;  %s4240_s20 = sphi %s4344_s20, %s4837_s20   ;;  %s4236_s19 = sphi %s4342_s19, %s4836_s19   ;;  %s4232_s18 = sphi %s4340_s18, %s4835_s18  }
   0x8   : > { %4810 = sst [smem:[#allocation12_spill]] %s4236_s19  ;;  %s3221_s23 = sadd.s32 4294967294, %s4244_s21  }
   0x9   : > { %4811 = sst [smem:[#allocation13_spill]] %s4240_s20  ;;  %s4365_s24 = sadd.s32 1, %s4244_s21  }
   0xa   : > { %4812 = sst [smem:[#allocation14_spill]] %s4244_s21  ;;  %s352_s25 = sadd.s32 1, %s4240_s20 }
   0xb   : > { %4813 = sst [smem:[#allocation15_spill]] %s4365_s24  ;;  %s349_s26 = ssub.s32 %s4244_s21, %s4365_s24 }
   0xc   : > { %p362_p0 = scmp.ne.s32.totalorder %s4240_s20, %s4236_s19  ;;  %p350_p1 = scmp.eq.s32.totalorder %s349_s26, 0 }
   0xd   : > { %p363_p2 = scmp.eq.s32.totalorder %s4361_s22, 1  ;;  %p368_p3 = scmp.ne.s32.totalorder %s4236_s19, %s4232_s18 }
   0xe   : > { %p369_p4 = scmp.eq.s32.totalorder %s3221_s23, 1  ;;  %p3222_p7 = scmp.ge.s32.totalorder %s4244_s21, 1 }
   0xf   : > { %s4376_s27 = scalar_select %p350_p1, %s4240_s20, %s352_s25  }
  0x10   : > { %p4378_p5 = por %p363_p2, %p362_p0  ;;  %p4382_p6 = por %p369_p4, %p368_p3 }
  0x11   : > { %4814 = sst [smem:[#allocation16_spill]] %s4376_s27  ;;  %p402_p8 = scmp.lt.s32.totalorder %s4244_s21, 3 }
  0x12   : > { %s4815_s28 = scalar_select %p4378_p5, 1, 0 }
  0x13   : > { %s4817_s29 = scalar_select %p4382_p6, 1, 0 }
  0x14   : > { %4816 = sst [smem:[#allocation17_spill]] %s4815_s28  ;;  %p4800_p9 = scmp.eq.s32.totalorder %s4361_s22, 0 }
  0x15   : > { %4818 = sst [smem:[#allocation18_spill]] %s4817_s29  ;;  %p4389_p10 = pnand %p3222_p7, %p402_p8 }
  0x16   : > { %s4246_s16 = smov [#allocation2]   ;;  %s4247_s25 = smov [#allocation5]  }
  0x17   : > { %s4819_s30 = scalar_select %p4389_p10, 1, 0 }
  0x18   : > { %s414_s17 = sshll.u32 %s4246_s16, 4  ;;  %p3622_p11 = pneg %p4389_p10  ;;  %s415_s17 = int_to_ptr.vmem [resolvable:$true] %s414_s17 }
  0x19   : > { %s448_s26 = sshll.u32 %s4247_s25, 4  ;;  %s4118_s24 = scalar_lea.hbm %s4782_s4, 12544  ;;  %s4401_s26 = int_to_ptr.vmem [resolvable:$true] %s448_s26 }
  0x1a   : > { %p4397_p12 = pnand %p4800_p9, %p3622_p11  ;;  %p4119_p13 = scmp.ne.s32.totalorder %s4782_s4, %s4118_s24 }
  0x1b   : > { %p4125_p3 = scmp.lt.u32.totalorder %s4118_s24, %s4782_s4 }
  0x1c   : > { %p4120_p0 = pneg %p4397_p12 }
  0x1e   : > { %p4121_p1 = pnand %p4120_p0, %p4119_p13 }
  0x20   : > { %p4122_p2 = pneg %p4121_p1 }
  0x22   : > { %p4127_p4 = pnand %p4125_p3, %p4122_p2 }
  0x24   : > { %4130 = shalt.err (!%p4127_p4)
}
  0x25   : > { %s4131_s25 = scalar_lea.vmem %s415_s17, 12544  ;;  %p4139_p9 = scmp.lt.s32.totalorder %s415_s17, %s415_s17 }
  0x26   : > { %p4132_p7 = scmp.ne.s32.totalorder %s415_s17, %s4131_s25  ;;  %p4140_p6 = scmp.lt.s32.totalorder %s4131_s25, %s4131_s25 }
  0x28   : > { %p4134_p8 = pnand %p4132_p7, %p4120_p0  ;;  %p4141_p5 = por %p4140_p6, %p4139_p9 }
  0x2a   : > { %p4135_p11 = pneg %p4134_p8 }
  0x2c   : > { %p4142_p10 = pnand %p4141_p5, %p4135_p11 }
  0x2e   : > { %4145 = shalt.err (!%p4142_p10)
}
  0x2f   : > { %s4248_s20 = smov 128   ;;  %s4249_s27 = smov 8  }
  0x30   : > { %3625 = dma.hbm_to_vmem [thread:$0]  (!%p4397_p12), %s4782_s4, 12544, %s415_s17, [#allocation3], %s4248_s20, %s4248_s20, %s4249_s27  }
  0x31   : > { %s4146_s16 = scalar_lea.hbm %s4790_s12, 14336 }
  0x32   : > { %p4147_p13 = scmp.ne.s32.totalorder %s4790_s12, %s4146_s16  ;;  %p4153_p9 = scmp.lt.u32.totalorder %s4146_s16, %s4790_s12 }
  0x34   : > { %p4149_p5 = pnand %p4147_p13, %p4120_p0 }
  0x36   : > { %p4150_p6 = pneg %p4149_p5 }
  0x38   : > { %p4155_p10 = pnand %p4153_p9, %p4150_p6 }
  0x3a   : > { %4158 = shalt.err (!%p4155_p10)
}
  0x3b   : > { %s4159_s17 = scalar_lea.vmem %s4401_s26, 14336  ;;  %p4167_p4 = scmp.lt.s32.totalorder %s4401_s26, %s4401_s26 }
  0x3c   : > { %p4160_p1 = scmp.ne.s32.totalorder %s4401_s26, %s4159_s17  ;;  %p4168_p7 = scmp.lt.s32.totalorder %s4159_s17, %s4159_s17 }
  0x3e   : > { %p4162_p2 = pnand %p4160_p1, %p4120_p0  ;;  %p4169_p8 = por %p4168_p7, %p4167_p4 }
  0x40   : > { %p4163_p3 = pneg %p4162_p2 }
  0x42   : > { %p4170_p11 = pnand %p4169_p8, %p4163_p3 }
  0x44   : > { %4173 = shalt.err (!%p4170_p11)
}
  0x45   : > { %s4250_s14 = smov 448   ;;  %s4251_s19 = smov 28  }
  0x46   : > { %3628 = dma.hbm_to_vmem [thread:$0]  (!%p4397_p12), %s4790_s12, 14336, %s4401_s26, [#allocation6], %s4250_s14, %s4250_s14, %s4251_s19  }
  0x47   : > { %p4821_p13 = scmp.ne.s32.totalorder %s4819_s30, 0 }
  0x48   : > { %p4822_p0 = scmp.eq.s32.totalorder (!%p4821_p13), %s4361_s22, 0 }
  0x49   : > { %505 = sbr.rel (%p4821_p13) target bundleno = 1927 (0x787), region = 76 }
  0x50   : > { %4219 = dma.done.wait (%p4822_p0), [#allocation3], 12544   ;;  %p4823_p5 = pmov %p4822_p0 }
  0x51   : > { %p4824_p6 = pmov %p4822_p0 }
  0x52   : > { %4221 = vsyncadd (%p4823_p5), [#allocation3], 4294954752 }
  0x53   : > { %4223 = dma.done.wait (%p4824_p6), [#allocation6], 14336   ;;  %p4825_p9 = pmov %p4822_p0 }
  0x54   : > { %v3683_v0 = vld [vmem:[#allocation2 + $0x4] ss:$8 sps:$4 sm:$0xff]   ;;  %v3685_v1 = vld [vmem:[#allocation2] ss:$8 sps:$4 sm:$0xff]   ;;  %v3686_v2 = vld [vmem:[#allocation2 + $0x14] ss:$8 sps:$4 sm:$0xff]  }
  0x55   : > { %4225 = vsyncadd (%p4825_p9), [#allocation6], 4294952960  ;;  %1252 = vmatprep.subr.bf16.mxu0 %v3683_v0  ;;  %v3688_v3 = vld [vmem:[#allocation2 + $0x10] ss:$8 sps:$4 sm:$0xff]   ;;  %v3689_v4 = vld [vmem:[#allocation2 + $0x24] ss:$8 sps:$4 sm:$0xff]  }
  0x56   : > { %1253 = vmatpush1.bf16.msra.mxu0 %v3685_v1  ;;  %s3229_s30 = sshll.u32 %s4361_s22, 1  ;;  %v3691_v5 = vld [vmem:[#allocation2 + $0x20] ss:$8 sps:$4 sm:$0xff]   ;;  %v3692_v6 = vld [vmem:[#allocation2 + $0x34] ss:$8 sps:$4 sm:$0xff]   ;;  %vm1248_vm0 = vcmask 130048  }
  0x57   : > { %1254 = vmatprep.subr.bf16.mxu0 %v3686_v2  ;;  %p580_p12 = scmp.lt.s32.totalorder %s3229_s30, 3  ;;  %v3694_v7 = vld [vmem:[#allocation2 + $0x30] ss:$8 sps:$4 sm:$0xff]   ;;  %v3695_v8 = vld [vmem:[#allocation2 + $0x44] ss:$8 sps:$4 sm:$0xff]   ;;  %vm4254_vm1 = vmmov 0  }
  0x58   : > { %v3697_v9 = vld [vmem:[#allocation2 + $0x40] ss:$8 sps:$4 sm:$0xff]   ;;  %v3698_v10 = vld [vmem:[#allocation2 + $0x54] ss:$8 sps:$4 sm:$0xff]   ;;  %v3700_v11 = vld [vmem:[#allocation2 + $0x50] ss:$8 sps:$4 sm:$0xff]  }
  0x59   : > { %s4839_s30 = smov (!%p580_p12, %s3229_s30), 3  ;;  %v3701_v12 = vld [vmem:[#allocation2 + $0x64] ss:$8 sps:$4 sm:$0xff]   ;;  %v3703_v14 = vld [vmem:[#allocation2 + $0x60] ss:$8 sps:$4 sm:$0xff]   ;;  %v3844_v51 = vld [vmem:[%s4783_s5 + $0x50] sm:$0xff]  }
  0x5a   : > { %1255 = vmatpush1.bf16.msra.mxu0 %v3688_v3  ;;  %s3610_s23 = smul.u32 28, %s4839_s30  ;;  %v3704_v15 = vld [vmem:[#allocation2 + $0x74] ss:$8 sps:$4 sm:$0xff]   ;;  %v3706_v16 = vld [vmem:[#allocation2 + $0x70] ss:$8 sps:$4 sm:$0xff]   ;;  %v3840_v44 = vld [vmem:[%s4783_s5 + $0x40] sm:$0xff]  }
  0x5b   : > { %1256 = vmatprep.subr.bf16.mxu0 %v3689_v4  ;;  %v3707_v17 = vld [vmem:[#allocation2 + $0x84] ss:$8 sps:$4 sm:$0xff]   ;;  %v3709_v18 = vld [vmem:[#allocation2 + $0x80] ss:$8 sps:$4 sm:$0xff]   ;;  %v3710_v19 = vld [vmem:[#allocation2 + $0x94] ss:$8 sps:$4 sm:$0xff]   ;;  %3509 = vmatprep.subr.bf16.mxu1 %v3840_v44 }
  0x5c   : > { %s4467_s18 = scalar_lea.vmem %s4778_s0, %s3610_s23  ;;  %v3712_v20 = vld [vmem:[#allocation2 + $0x90] ss:$8 sps:$4 sm:$0xff]   ;;  %v3713_v21 = vld [vmem:[#allocation2 + $0xa4] ss:$8 sps:$4 sm:$0xff]   ;;  %v3715_v22 = vld [vmem:[#allocation2 + $0xa0] ss:$8 sps:$4 sm:$0xff]  }
  0x5d   : > { %v3733_v13 = vld [vmem:[%s4467_s18 + $0x4] ss:$28 sps:$4 sm:$0xff]   ;;  %v3716_v23 = vld [vmem:[#allocation2 + $0xb4] ss:$8 sps:$4 sm:$0xff]   ;;  %v3718_v24 = vld [vmem:[#allocation2 + $0xb0] ss:$8 sps:$4 sm:$0xff]  }
  0x5e   : > { %1257 = vmatpush1.bf16.msra.mxu0 %v3691_v5  ;;  %1284 = vmatprep.mubr.bf16.mxu0 %v3733_v13  ;;  %v3719_v25 = vld [vmem:[#allocation2 + $0xc4] ss:$8 sps:$4 sm:$0xff]   ;;  %v3721_v26 = vld [vmem:[#allocation2 + $0xc0] ss:$8 sps:$4 sm:$0xff]   ;;  %v3722_v27 = vld [vmem:[#allocation2 + $0xd4] ss:$8 sps:$4 sm:$0xff]  }
  0x5f   : > { %1258 = vmatprep.subr.bf16.mxu0 %v3692_v6  ;;  %v3724_v28 = vld [vmem:[#allocation2 + $0xd0] ss:$8 sps:$4 sm:$0xff]   ;;  %v3725_v29 = vld [vmem:[#allocation2 + $0xe4] ss:$8 sps:$4 sm:$0xff]   ;;  %v3727_v30 = vld [vmem:[#allocation2 + $0xe0] ss:$8 sps:$4 sm:$0xff]  }
  0x60   : > { %v3728_v31 = vld [vmem:[#allocation2 + $0xf4] ss:$8 sps:$4 sm:$0xff]   ;;  %v3730_v32 = vld [vmem:[#allocation2 + $0xf0] ss:$8 sps:$4 sm:$0xff]   ;;  %v3736_v33 = vld [vmem:[#allocation2 + $0x104] ss:$8 sps:$4 sm:$0xff]  }
  0x61   : > { %v3731_v34 = vld [vmem:[%s4467_s18] ss:$28 sps:$4 sm:$0xff]   ;;  %v3784_v36 = vld [vmem:[%s4467_s18 + $0xc] ss:$28 sps:$4 sm:$0xff]   ;;  %v3737_v38 = vld [vmem:[#allocation2 + $0x110] ss:$8 sps:$4 sm:$0xff]  }
  0x62   : > { %1259 = vmatpush1.bf16.msra.mxu0 %v3694_v7  ;;  %v3734_v35 = vld [vmem:[#allocation2 + $0x100] ss:$8 sps:$4 sm:$0xff]   ;;  %v3739_v37 = vld [vmem:[#allocation2 + $0x114] ss:$8 sps:$4 sm:$0xff]   ;;  %v3742_v39 = vld [vmem:[#allocation2 + $0x124] ss:$8 sps:$4 sm:$0xff]  }
  0x63   : > { %1260 = vmatprep.subr.bf16.mxu0 %v3695_v8  ;;  %v3740_v40 = vld [vmem:[#allocation2 + $0x120] ss:$8 sps:$4 sm:$0xff]   ;;  %v3745_v41 = vld [vmem:[#allocation2 + $0x134] ss:$8 sps:$4 sm:$0xff]   ;;  %v3743_v42 = vld [vmem:[#allocation2 + $0x130] ss:$8 sps:$4 sm:$0xff]  }
  0x64   : > { %v3748_v43 = vld [vmem:[#allocation2 + $0x144] ss:$8 sps:$4 sm:$0xff]   ;;  %v3746_v47 = vld [vmem:[#allocation2 + $0x140] ss:$8 sps:$4 sm:$0xff]   ;;  %v3751_v48 = vld [vmem:[#allocation2 + $0x154] ss:$8 sps:$4 sm:$0xff]  }
  0x65   : > { %v3841_v45 = vld [vmem:[%s4783_s5] sm:$0xff]   ;;  %v3842_v46 = vld [vmem:[%s4783_s5 + $0x48] sm:$0xff]   ;;  %v3749_v49 = vld [vmem:[#allocation2 + $0x150] ss:$8 sps:$4 sm:$0xff]   ;;  %s3508_s17 = sshll.u32 %s4839_s30, 4  ;;  %s4565_s26 = sshll.u32 %s4839_s30, 3 }
  0x66   : > { %1261 = vmatpush1.bf16.msra.mxu0 %v3697_v9  ;;  %3510 = vmatpush3.bf16.msra.mxu1 %v3841_v45  ;;  %v3843_v50 = vld [vmem:[%s4783_s5 + $0x8] sm:$0xff]   ;;  %v3845_v53 = vld [vmem:[%s4783_s5 + $0x10] sm:$0xff]   ;;  %v3846_v54 = vld [vmem:[%s4783_s5 + $0x58] sm:$0xff]   ;;  %s597_s28 = scalar_lea.vmem %s4780_s2, %s3508_s17  ;;  %s590_s24 = scalar_lea.vmem %s4779_s1, %s4565_s26  ;;  %vm1795_vm4 = vcmask 261120  }
  0x67   : > { %1262 = vmatprep.subr.bf16.mxu0 %v3698_v10  ;;  %v3754_v52 = vld [vmem:[#allocation2 + $0x164] ss:$8 sps:$4 sm:$0xff]   ;;  %3511 = vmatprep.subr.bf16.mxu1 %v3842_v46  ;;  %v3752_v55 = vld [vmem:[#allocation2 + $0x160] ss:$8 sps:$4 sm:$0xff]   ;;  %v3757_v56 = vld [vmem:[#allocation2 + $0x174] ss:$8 sps:$4 sm:$0xff]  }
  0x68   : > { %v3847_v57 = vld [vmem:[%s4783_s5 + $0x18] sm:$0xff]   ;;  %v3848_v58 = vld [vmem:[%s4783_s5 + $0x60] sm:$0xff]   ;;  %v3850_v62 = vld [vmem:[%s4783_s5 + $0x68] sm:$0xff]   ;;  %s4255_s29 = smov 32   ;;  %s4256_s17 = smov 96  }
  0x69   : > { %v3755_v59 = vld [vmem:[#allocation2 + $0x170] ss:$8 sps:$4 sm:$0xff]   ;;  %v3760_v60 = vld [vmem:[#allocation2 + $0x184] ss:$8 sps:$4 sm:$0xff]   ;;  %v3758_v63 = vld [vmem:[#allocation2 + $0x180] ss:$8 sps:$4 sm:$0xff]  }
  0x6a   : > { %1263 = vmatpush1.bf16.msra.mxu0 %v3700_v11  ;;  %3512 = vmatpush3.bf16.msra.mxu1 %v3843_v50  ;;  %v3849_v61 = vld [vmem:[%s4783_s5 + $0x20] sm:$0xff]   ;;  %v3763_v0 = vld [vmem:[#allocation2 + $0x194] ss:$8 sps:$4 sm:$0xff]   ;;  %v3761_v1 = vld [vmem:[#allocation2 + $0x190] ss:$8 sps:$4 sm:$0xff]   ;;  %s4826_s20 = sld [smem:[#allocation12_spill]] }
  0x6b   : > { %1264 = vmatprep.subr.bf16.mxu0 %v3701_v12  ;;  %3513 = vmatprep.subr.bf16.mxu1 %v3844_v51  ;;  %v3766_v2 = vld [vmem:[#allocation2 + $0x1a4] ss:$8 sps:$4 sm:$0xff]   ;;  %v3764_v3 = vld [vmem:[#allocation2 + $0x1a0] ss:$8 sps:$4 sm:$0xff]   ;;  %v3769_v4 = vld [vmem:[#allocation2 + $0x1b4] ss:$8 sps:$4 sm:$0xff]  }
  0x6c   : > { %v3767_v5 = vld [vmem:[#allocation2 + $0x1b0] ss:$8 sps:$4 sm:$0xff]   ;;  %v3772_v6 = vld [vmem:[#allocation2 + $0x1c4] ss:$8 sps:$4 sm:$0xff]   ;;  %v3770_v7 = vld [vmem:[#allocation2 + $0x1c0] ss:$8 sps:$4 sm:$0xff]  }
  0x6d   : > { %v3775_v8 = vld [vmem:[#allocation2 + $0x1d4] ss:$8 sps:$4 sm:$0xff]   ;;  %v3773_v9 = vld [vmem:[#allocation2 + $0x1d0] ss:$8 sps:$4 sm:$0xff]   ;;  %v3778_v10 = vld [vmem:[#allocation2 + $0x1e4] ss:$8 sps:$4 sm:$0xff]  }
  0x6e   : > { %1265 = vmatpush1.bf16.msra.mxu0 %v3703_v14  ;;  %3514 = vmatpush3.bf16.msra.mxu1 %v3845_v53  ;;  %v3776_v11 = vld [vmem:[#allocation2 + $0x1e0] ss:$8 sps:$4 sm:$0xff]   ;;  %v3781_v12 = vld [vmem:[#allocation2 + $0x1f4] ss:$8 sps:$4 sm:$0xff]   ;;  %v3779_v13 = vld [vmem:[#allocation2 + $0x1f0] ss:$8 sps:$4 sm:$0xff]  }
  0x6f   : > { %1266 = vmatprep.subr.bf16.mxu0 %v3704_v15  ;;  %3515 = vmatprep.subr.bf16.mxu1 %v3846_v54  ;;  %v3787_v14 = vld [vmem:[#allocation2 + $0x204] ss:$8 sps:$4 sm:$0xff]   ;;  %v3827_v45 = vld [vmem:[#allocation2 + $0x2e0] ss:$8 sps:$4 sm:$0xff]   ;;  %v3832_v46 = vld [vmem:[#allocation2 + $0x2f4] ss:$8 sps:$4 sm:$0xff]  }
  0x70   : > { %v3782_v15 = vld [vmem:[%s4467_s18 + $0x8] ss:$28 sps:$4 sm:$0xff]   ;;  %v4252_v51 = vmov 0   ;;  %v3852_v54 = vld [vmem:[%s4783_s5 + $0x70] sm:$0xff]   ;;  %s569_s23 = sand.u32 1, %s4826_s20   ;;  %s4828_s25 = sld [smem:[#allocation19_spill]] }
  0x71   : > { %v3829_v44 = vld [vmem:[#allocation2 + $0x2e4] ss:$8 sps:$4 sm:$0xff]   ;;  %v3836_v50 = vld [vmem:[#allocation2 + $0x300] ss:$8 sps:$4 sm:$0xff]   ;;  %s3609_s27 = smul.u32 112, %s569_s23  ;;  %s4257_s14 = smov [#allocation7]  }
  0x72   : > { %1267 = vmatpush1.bf16.msra.mxu0 %v3706_v16  ;;  %3516 = vmatpush3.bf16.msra.mxu1 %v3847_v57  ;;  %v3785_v16 = vld [vmem:[#allocation2 + $0x200] ss:$8 sps:$4 sm:$0xff]   ;;  %v3855_v57 = vld [vmem:[%s4783_s5 + $0x38] sm:$0xff]   ;;  %s4178_s19 = sshll.u32 %s4257_s14, 4  ;;  %s4179_s19 = int_to_ptr.vmem [resolvable:$false] %s4178_s19 }
  0x73   : > { %1268 = vmatprep.subr.bf16.mxu0 %v3707_v17  ;;  %3517 = vmatprep.subr.bf16.mxu1 %v3848_v58  ;;  %v3835_v17 = vld [vmem:[%s4467_s18 + $0x14] ss:$28 sps:$4 sm:$0xff]   ;;  %v3851_v53 = vld [vmem:[%s4783_s5 + $0x28] sm:$0xff]   ;;  %v4253_v58 = vmov 0.0   ;;  %s4704_s21 = scalar_lea.vmem [#allocation7], %s3609_s27 }
  0x74   : > { %s3072_s16 = sshll.u32 %s4704_s21, 4  ;;  %s4726_s16 = int_to_ptr.vmem [resolvable:$true] %s3072_s16 }
  0x75   : > { %p4181_p4 = scmp.lt.s32.totalorder %s4726_s16, %s4179_s19 }
  0x76   : > { %1269 = vmatpush1.bf16.msra.mxu0 %v3709_v18  ;;  %3518 = vmatpush3.bf16.msra.mxu1 %v3849_v61  ;;  %v3790_v18 = vld [vmem:[#allocation2 + $0x214] ss:$8 sps:$4 sm:$0xff]  }
  0x77   : > { %1270 = vmatprep.subr.bf16.mxu0 %v3710_v19  ;;  %3519 = vmatprep.subr.bf16.mxu1 %v3850_v62  ;;  %v3788_v19 = vld [vmem:[#allocation2 + $0x210] ss:$8 sps:$4 sm:$0xff]  }
  0x78   : > { %v721_v62 = vld [vmem:[%s597_s28 + $0x10] sm:$0xff] }
  0x7a   : > { %1271 = vmatpush1.bf16.msra.mxu0 %v3712_v20  ;;  %v3793_v20 = vld [vmem:[#allocation2 + $0x224] ss:$8 sps:$4 sm:$0xff]   ;;  %3520 = vmatpush3.bf16.msra.mxu1 %v3851_v53 }
  0x7b   : > { %1272 = vmatprep.subr.bf16.mxu0 %v3713_v21  ;;  %v3791_v21 = vld [vmem:[#allocation2 + $0x220] ss:$8 sps:$4 sm:$0xff]   ;;  %3521 = vmatprep.subr.bf16.mxu1 %v3852_v54 }
  0x7e   : > { %1273 = vmatpush1.bf16.msra.mxu0 %v3715_v22  ;;  %v3796_v22 = vld [vmem:[#allocation2 + $0x234] ss:$8 sps:$4 sm:$0xff]  }
  0x7f   : > { %1274 = vmatprep.subr.bf16.mxu0 %v3716_v23  ;;  %v3794_v23 = vld [vmem:[#allocation2 + $0x230] ss:$8 sps:$4 sm:$0xff]  }
  0x82   : > { %1275 = vmatpush1.bf16.msra.mxu0 %v3718_v24  ;;  %v3799_v24 = vld [vmem:[#allocation2 + $0x244] ss:$8 sps:$4 sm:$0xff]  }
  0x83   : > { %1276 = vmatprep.subr.bf16.mxu0 %v3719_v25  ;;  %v3797_v25 = vld [vmem:[#allocation2 + $0x240] ss:$8 sps:$4 sm:$0xff]  }
  0x86   : > { %1277 = vmatpush1.bf16.msra.mxu0 %v3721_v26  ;;  %v3802_v26 = vld [vmem:[#allocation2 + $0x254] ss:$8 sps:$4 sm:$0xff]  }
  0x87   : > { %1278 = vmatprep.subr.bf16.mxu0 %v3722_v27  ;;  %v3800_v27 = vld [vmem:[#allocation2 + $0x250] ss:$8 sps:$4 sm:$0xff]  }
  0x8a   : > { %1279 = vmatpush1.bf16.msra.mxu0 %v3724_v28  ;;  %v3805_v28 = vld [vmem:[#allocation2 + $0x264] ss:$8 sps:$4 sm:$0xff]  }
  0x8b   : > { %1280 = vmatprep.subr.bf16.mxu0 %v3725_v29  ;;  %v3803_v29 = vld [vmem:[#allocation2 + $0x260] ss:$8 sps:$4 sm:$0xff]  }
  0x8e   : > { %1281 = vmatpush1.bf16.msra.mxu0 %v3727_v30  ;;  %v3808_v30 = vld [vmem:[#allocation2 + $0x274] ss:$8 sps:$4 sm:$0xff]  }
  0x8f   : > { %1282 = vmatprep.subr.bf16.mxu0 %v3728_v31  ;;  %v3806_v31 = vld [vmem:[#allocation2 + $0x270] ss:$8 sps:$4 sm:$0xff]  }
  0x92   : > { %1283 = vmatpush1.bf16.msra.mxu0 %v3730_v32  ;;  %v3811_v32 = vld [vmem:[#allocation2 + $0x284] ss:$8 sps:$4 sm:$0xff]  }
  0x93   : > { %1295 = vmatprep.subr.bf16.mxu0 %v3736_v33  ;;  %v3809_v33 = vld [vmem:[#allocation2 + $0x280] ss:$8 sps:$4 sm:$0xff]  }
  0x95   : > { %1285 = vmatmul.mubr.bf16.vlgmr.msra.gmra.mrb[0].mxu0 %v3731_v34  ;;  %v3814_v34 = vld [vmem:[#allocation2 + $0x294] ss:$8 sps:$4 sm:$0xff]  }
  0x96   : > { %1296 = vmatpush1.bf16.msra.mxu0 %v3734_v35  ;;  %1327 = vmatprep.mubr.bf16.mxu0 %v3784_v36  ;;  %v3812_v35 = vld [vmem:[#allocation2 + $0x290] ss:$8 sps:$4 sm:$0xff]   ;;  %v3817_v36 = vld [vmem:[#allocation2 + $0x2a4] ss:$8 sps:$4 sm:$0xff]  }
  0x97   : > { %1297 = vmatprep.subr.bf16.mxu0 %v3739_v37  ;;  %v3815_v37 = vld [vmem:[#allocation2 + $0x2a0] ss:$8 sps:$4 sm:$0xff]  }
  0x9a   : > { %1298 = vmatpush1.bf16.msra.mxu0 %v3737_v38  ;;  %v3820_v38 = vld [vmem:[#allocation2 + $0x2b4] ss:$8 sps:$4 sm:$0xff]  }
  0x9b   : > { %1299 = vmatprep.subr.bf16.mxu0 %v3742_v39  ;;  %v3818_v39 = vld [vmem:[#allocation2 + $0x2b0] ss:$8 sps:$4 sm:$0xff]  }
  0x9e   : > { %1300 = vmatpush1.bf16.msra.mxu0 %v3740_v40  ;;  %v3823_v40 = vld [vmem:[#allocation2 + $0x2c4] ss:$8 sps:$4 sm:$0xff]  }
  0x9f   : > { %1301 = vmatprep.subr.bf16.mxu0 %v3745_v41  ;;  %v3821_v41 = vld [vmem:[#allocation2 + $0x2c0] ss:$8 sps:$4 sm:$0xff]  }
  0xa2   : > { %1302 = vmatpush1.bf16.msra.mxu0 %v3743_v42  ;;  %v3826_v42 = vld [vmem:[#allocation2 + $0x2d4] ss:$8 sps:$4 sm:$0xff]  }
  0xa3   : > { %1303 = vmatprep.subr.bf16.mxu0 %v3748_v43  ;;  %v3824_v43 = vld [vmem:[#allocation2 + $0x2d0] ss:$8 sps:$4 sm:$0xff]  }
  0xa6   : > { %1304 = vmatpush1.bf16.msra.mxu0 %v3746_v47  ;;  %v3830_v47 = vld [vmem:[#allocation2 + $0x2f0] ss:$8 sps:$4 sm:$0xff]  }
  0xa7   : > { %1305 = vmatprep.subr.bf16.mxu0 %v3751_v48  ;;  %v3838_v48 = vld [vmem:[#allocation2 + $0x304] ss:$8 sps:$4 sm:$0xff]  }
  0xaa   : > { %1306 = vmatpush1.bf16.msra.mxu0 %v3749_v49  ;;  %v3833_v49 = vld [vmem:[%s4467_s18 + $0x10] ss:$28 sps:$4 sm:$0xff]  }
  0xab   : > { %1307 = vmatprep.subr.bf16.mxu0 %v3754_v52  ;;  %v3839_v52 = vld [vmem:[%s4467_s18 + $0x18] ss:$28 sps:$4 sm:$0xff]   ;;  %s610_s18 = scalar_lea.vmem %s4793_s15, %s4565_s26 }
  0xae   : > { %1308 = vmatpush1.bf16.msra.mxu0 %v3752_v55  ;;  %v3853_v55 = vld [vmem:[%s4783_s5 + $0x30] sm:$0xff]  }
  0xaf   : > { %1309 = vmatprep.subr.bf16.mxu0 %v3757_v56  ;;  %3522 = vmatpush3.bf16.msra.mxu1 %v3853_v55  ;;  %v3854_v56 = vld [vmem:[%s4783_s5 + $0x78] sm:$0xff]  }
  0xb0   : > { %3523 = vmatprep.subr.bf16.mxu1 %v3854_v56 }
  0xb2   : > { %1310 = vmatpush1.bf16.msra.mxu0 %v3755_v59  ;;  %v719_v59 = vld [vmem:[%s597_s28] sm:$0xff] }
  0xb3   : > { %1311 = vmatprep.subr.bf16.mxu0 %v3760_v60  ;;  %3524 = vmatpush3.bf16.msra.mxu1 %v3855_v57  ;;  %v720_v60 = vld [vmem:[%s597_s28 + $0x8] sm:$0xff] }
  0xb4   : > { %3565 = vmatprep.subr.bf16.mxu1 %v4253_v58 }
  0xb6   : > { %1312 = vmatpush1.bf16.msra.mxu0 %v3758_v63 }
  0xb7   : > { %1313 = vmatprep.subr.bf16.mxu0 %v3763_v0 }
  0xba   : > { %1314 = vmatpush1.bf16.msra.mxu0 %v3761_v1  ;;  %v722_v1 = vld [vmem:[%s597_s28 + $0x18] sm:$0xff]  ;;  %s4180_s28 = scalar_lea.vmem %s4179_s19, 3584 }
  0xbb   : > { %1315 = vmatprep.subr.bf16.mxu0 %v3766_v2 }
  0xbe   : > { %1316 = vmatpush1.bf16.msra.mxu0 %v3764_v3 }
  0xbf   : > { %1317 = vmatprep.subr.bf16.mxu0 %v3769_v4 }
  0xc2   : > { %1318 = vmatpush1.bf16.msra.mxu0 %v3767_v5 }
  0xc3   : > { %1319 = vmatprep.subr.bf16.mxu0 %v3772_v6 }
  0xc6   : > { %1320 = vmatpush1.bf16.msra.mxu0 %v3770_v7 }
  0xc7   : > { %1321 = vmatprep.subr.bf16.mxu0 %v3775_v8 }
  0xca   : > { %1322 = vmatpush1.bf16.msra.mxu0 %v3773_v9 }
  0xcb   : > { %1323 = vmatprep.subr.bf16.mxu0 %v3778_v10 }
  0xce   : > { %1324 = vmatpush1.bf16.msra.mxu0 %v3776_v11 }
  0xcf   : > { %1325 = vmatprep.subr.bf16.mxu0 %v3781_v12 }
  0xd2   : > { %1326 = vmatpush1.bf16.msra.mxu0 %v3779_v13  ;;  %v3856_v13 = vld [vmem:[%s4785_s7] sm:$0xff]  }
  0xd3   : > { %1338 = vmatprep.subr.bf16.mxu0 %v3787_v14  ;;  %v3857_v14 = vld [vmem:[%s4785_s7 + $0x8] sm:$0xff]  }
  0xd5   : > { %1328 = vmatmul.mubr.bf16.vlgmr.msra.gmra.mrb[0].mxu0 %v3782_v15  ;;  %v3858_v15 = vld [vmem:[%s4785_s7 + $0x10] sm:$0xff]  }
  0xd6   : > { %1339 = vmatpush1.bf16.msra.mxu0 %v3785_v16  ;;  %1370 = vmatprep.mubr.bf16.mxu0 %v3835_v17  ;;  %v3859_v16 = vld [vmem:[%s4785_s7 + $0x18] sm:$0xff]   ;;  %v3860_v17 = vld [vmem:[%s4785_s7 + $0x20] sm:$0xff]  }
  0xd7   : > { %1340 = vmatprep.subr.bf16.mxu0 %v3790_v18  ;;  %v3861_v18 = vld [vmem:[%s4785_s7 + $0x28] sm:$0xff]  }
  0xda   : > { %1341 = vmatpush1.bf16.msra.mxu0 %v3788_v19  ;;  %v3862_v19 = vld [vmem:[%s4785_s7 + $0x30] sm:$0xff]  }
  0xdb   : > { %1342 = vmatprep.subr.bf16.mxu0 %v3793_v20  ;;  %v3863_v20 = vld [vmem:[%s4785_s7 + $0x38] sm:$0xff]  }
  0xde   : > { %1343 = vmatpush1.bf16.msra.mxu0 %v3791_v21  ;;  %v4571_v21 = vld [vmem:[%s590_s24] sm:$0xff] }
  0xdf   : > { %1344 = vmatprep.subr.bf16.mxu0 %v3796_v22  ;;  %1761 = vrot.lane.b32.xlu0 %v4571_v21, %s4255_s29  ;;  %v4574_v22 = vld [vmem:[%s590_s24 + $0x8] sm:$0xff]  ;;  %s4827_s24 = sld [smem:[#allocation17_spill]] }
  0xe2   : > { %1345 = vmatpush1.bf16.msra.mxu0 %v3794_v23 }
  0xe3   : > { %1346 = vmatprep.subr.bf16.mxu0 %v3799_v24  ;;  %1763 = vrot.lane.b32.xlu0 %v4574_v22, %s4255_s29  ;;  %v3346_v24 = vld [vmem:[%s4784_s6] ss:$0 sm:$0xff]  ;;  %s3611_s29 = smul.u32 1792, %s4361_s22  ;;  %s4174_s22 = scalar_lea.vmem %s4726_s16, 1792 }
  0xe4   : > { %p4175_p10 = scmp.ne.s32.totalorder %s4726_s16, %s4174_s22  ;;  %p4182_p7 = scmp.lt.s32.totalorder %s4180_s28, %s4174_s22 }
  0xe5   : > { %p4829_p1 = scmp.ne.s32.totalorder %s4827_s24, 0 }
  0xe6   : > { %1347 = vmatpush1.bf16.msra.mxu0 %v3797_v25  ;;  %p4183_p8 = por %p4182_p7, %p4181_p4 }
  0xe7   : > { %1348 = vmatprep.subr.bf16.mxu0 %v3802_v26  ;;  %p4176_p2 = pnand %p4175_p10, %p4829_p1 }
  0xe9   : > { %p4177_p3 = pneg %p4176_p2 }
  0xea   : > { %1349 = vmatpush1.bf16.msra.mxu0 %v3800_v27 }
  0xeb   : > { %1350 = vmatprep.subr.bf16.mxu0 %v3805_v28  ;;  %p4184_p11 = pnand %p4183_p8, %p4177_p3 }
  0xee   : > { %1351 = vmatpush1.bf16.msra.mxu0 %v3803_v29 }
  0xef   : > { %1352 = vmatprep.subr.bf16.mxu0 %v3808_v30 }
  0xf2   : > { %1353 = vmatpush1.bf16.msra.mxu0 %v3806_v31 }
  0xf3   : > { %1354 = vmatprep.subr.bf16.mxu0 %v3811_v32 }
  0xf6   : > { %1355 = vmatpush1.bf16.msra.mxu0 %v3809_v33 }
  0xf7   : > { %1356 = vmatprep.subr.bf16.mxu0 %v3814_v34 }
  0xfa   : > { %1357 = vmatpush1.bf16.msra.mxu0 %v3812_v35  ;;  %v3363_v35 = vld [vmem:[%s4786_s8] ss:$0 sm:$0xff] }
  0xfb   : > { %1358 = vmatprep.subr.bf16.mxu0 %v3817_v36 }
  0xfe   : > { %1359 = vmatpush1.bf16.msra.mxu0 %v3815_v37 }
  0xff   : > { %1360 = vmatprep.subr.bf16.mxu0 %v3820_v38 }
 0x102   : > { %1361 = vmatpush1.bf16.msra.mxu0 %v3818_v39 }
 0x103   : > { %1362 = vmatprep.subr.bf16.mxu0 %v3823_v40 }
 0x106   : > { %1363 = vmatpush1.bf16.msra.mxu0 %v3821_v41 }
 0x107   : > { %1364 = vmatprep.subr.bf16.mxu0 %v3826_v42 }
 0x10a   : > { %1365 = vmatpush1.bf16.msra.mxu0 %v3824_v43 }
 0x10b   : > { %1366 = vmatprep.subr.bf16.mxu0 %v3829_v44 }
 0x10e   : > { %1367 = vmatpush1.bf16.msra.mxu0 %v3827_v45 }
 0x10f   : > { %1368 = vmatprep.subr.bf16.mxu0 %v3832_v46 }
 0x112   : > { %1369 = vmatpush1.bf16.msra.mxu0 %v3830_v47 }
 0x113   : > { %1381 = vmatprep.subr.bf16.mxu0 %v3838_v48 }
 0x115   : > { %1371 = vmatmul.mubr.bf16.vlgmr.msra.gmra.mrb[0].mxu0 %v3833_v49 }
 0x116   : > { %1382 = vmatpush1.bf16.msra.mxu0 %v3836_v50  ;;  %1413 = vmatprep.mubr.bf16.mxu0 %v4252_v51 }
 0x121   : > { %3345 = vmatmul.mubr.msk.bf16.vlgmr.msra.gmra.mrb[0].mxu0 %vm1248_vm0, %v3839_v52 }
 0x1f4   : > { %v1415_v61 = vpop.f32.mrb[0].mxu0 }
 0x1f5   : > { %v3593_v63 = vadd.f32 %v1415_v61, %v719_v59  ;;  %v1417_v0 = vpop.f32.mrb[1].mxu0 }
 0x1f6   : > { %v3594_v2 = vadd.f32 %v1417_v0, %v720_v60  ;;  %v1419_v3 = vpop.f32.mrb[2].mxu0 }
 0x1f7   : > { %v3595_v4 = vadd.f32 %v1419_v3, %v721_v62  ;;  %v1421_v5 = vpop.f32.mrb[3].mxu0  ;;  %v1424_v7 = vmax.f32 %v3593_v63, 0.0 }
 0x1f8   : > { %v3596_v6 = vadd.f32 %v1421_v5, %v722_v1  ;;  %v1425_v9 = vmax.f32 %v3594_v2, 0.0 }
 0x1f9   : > { %v1426_v8 = vmax.f32 %v3595_v4, 0.0 }
 0x1fa   : > { %v1427_v10 = vmax.f32 %v3596_v6, 0.0 }
 0x1fb   : > { %v1428_v11 = vpack.c.bf16 %v1426_v8, %v1424_v7 }
 0x1fc   : > { %v1429_v12 = vpack.c.bf16 %v1427_v10, %v1425_v9 }
 0x1fe   : > { %1597 = vmatprep.mubr.bf16.mxu1 %v1429_v12  ;;  %v3864_v12 = vld [vmem:[%s4787_s9] sm:$0xff]  }
 0x1ff   : > { %1598 = vmatmul.mubr.bf16.vlgmr.msra.gmra.mrb[0].mxu1 %v1428_v11 }
 0x200   : > { %3566 = vmatpush3.bf16.msra.mxu1 %v3856_v13  ;;  %3581 = vmatprep.mubr.msk.bf16.mxu1 %vm4254_vm1, %v4253_v58  ;;  %v3865_v13 = vld [vmem:[%s4787_s9 + $0x8] sm:$0xff]  }
 0x201   : > { %3567 = vmatprep.subr.bf16.mxu1 %v4253_v58 }
 0x204   : > { %3568 = vmatpush3.bf16.msra.mxu1 %v3857_v14  ;;  %v1762_v14 = vpop.permute.xlu0 %1761 }
 0x205   : > { %3569 = vmatprep.subr.bf16.mxu1 %v4253_v58 }
 0x208   : > { %3570 = vmatpush3.bf16.msra.mxu1 %v3858_v15 }
 0x209   : > { %3571 = vmatprep.subr.bf16.mxu1 %v4253_v58 }
 0x20c   : > { %3572 = vmatpush3.bf16.msra.mxu1 %v3859_v16 }
 0x20d   : > { %3573 = vmatprep.subr.bf16.mxu1 %v4253_v58 }
 0x210   : > { %3574 = vmatpush3.bf16.msra.mxu1 %v3860_v17 }
 0x211   : > { %3575 = vmatprep.subr.bf16.mxu1 %v4253_v58 }
 0x214   : > { %3576 = vmatpush3.bf16.msra.mxu1 %v3861_v18  ;;  %v1764_v18 = vpop.permute.xlu0 %1763 }
 0x215   : > { %3577 = vmatprep.subr.bf16.mxu1 %v4253_v58 }
 0x218   : > { %3578 = vmatpush3.bf16.msra.mxu1 %v3862_v19 }
 0x219   : > { %3579 = vmatprep.subr.bf16.mxu1 %v4253_v58 }
 0x21c   : > { %3580 = vmatpush3.bf16.msra.mxu1 %v3863_v20 }
 0x21d   : > { %3585 = vmatprep.subr.bf16.mxu1 %v4253_v58 }
 0x2d2   : > { %v3525_v23 = vpop.f32.mrb[0].mxu1 }
 0x2d3   : > { %v3526_v25 = vpop.f32.mrb[1].mxu1 }
 0x2d4   : > { %v3527_v26 = vadd.f32 %v3526_v25, %v3525_v23  ;;  %v3528_v27 = vpop.f32.mrb[2].mxu1  ;;  %v1781_v23 = vmul.f32 %v4571_v21, %v4571_v21 }
 0x2d5   : > { %v3529_v28 = vpop.f32.mrb[3].mxu1 }
 0x2d6   : > { %v1600_v29 = vadd.f32 %v3527_v26, %v3346_v24  ;;  %v3530_v30 = vadd.f32 %v3529_v28, %v3528_v27  ;;  %v1782_v26 = vmul.f32 %v4574_v22, %v4574_v22  ;;  %v3866_v22 = vld [vmem:[%s4788_s10] ss:$8 sps:$4 sm:$0xff]  }
 0x2d8   : > { %v1603_v31 = vadd.f32 %v3530_v30, %v3346_v24  ;;  %v1606_v32 = vmax.f32 %v1600_v29, 0.0 }
 0x2da   : > { %v1607_v33 = vmax.f32 %v1603_v31, 0.0 }
 0x2dc   : > { %v1608_v34 = vpack.c.bf16 %v1607_v33, %v1606_v32 }
 0x2de   : > { %3582 = vmatmul.mubr.bf16.vlgmr.msra.gmra.mrb[4].mxu1 %v1608_v34 }
 0x2df   : > { %3589 = vmatprep.mubr.msk.bf16.mxu1 %vm4254_vm1, %v4253_v58  ;;  %3586 = vmatpush3.bf16.msra.mxu1 %v3864_v12  ;;  %v3959_v12 = vld [vmem:[#allocation5 + $0x278] ss:$28 sps:$4 sm:$0xff]  }
 0x2e0   : > { %3587 = vmatprep.subr.bf16.mxu1 %v4253_v58 }
 0x2e3   : > { %3588 = vmatpush3.bf16.msra.mxu1 %v3865_v13  ;;  %v3961_v13 = vld [vmem:[#allocation5 + $0x27c] ss:$28 sps:$4 sm:$0xff]  }
 0x3b1   : > { %v1714_v36 = vpop.f32.mrb[4].mxu1 }
 0x3b2   : > { %v4585_v37 = vadd.f32 %v3363_v35, %v1714_v36  ;;  %v3583_v38 = vpop.f32.mrb[5].mxu1 }
 0x3b3   : > { %v1717_v39 = vpop.f32.mrb[6].mxu1  ;;  %v3871_v38 = vld [vmem:[%s4788_s10 + $0x14] ss:$8 sps:$4 sm:$0xff]  }
 0x3b4   : > { %v1723_v40 = vand.u32 2147483647, %v4585_v37  ;;  %v4588_v41 = vadd.f32 %v3363_v35, %v1717_v39  ;;  %v3584_v42 = vpop.f32.mrb[7].mxu1  ;;  %v1721_v0 = vmax.f32 %v4585_v37, 0.0  ;;  %v3874_v39 = vld [vmem:[%s4788_s10 + $0x24] ss:$8 sps:$4 sm:$0xff]  }
 0x3b5   : > { %v3875_v42 = vld [vmem:[%s4788_s10 + $0x30] ss:$8 sps:$4 sm:$0xff]  }
 0x3b6   : > { %v1725_v43 = vsub.f32 0.0, %v1723_v40  ;;  %v1724_v44 = vand.u32 2147483647, %v4588_v41  ;;  %v1722_v4 = vmax.f32 %v4588_v41, 0.0  ;;  %v3872_v40 = vld [vmem:[%s4788_s10 + $0x20] ss:$8 sps:$4 sm:$0xff]  }
 0x3b8   : > { %v1727_v45 = vmul.f32 1.442695, %v1725_v43  ;;  %v1726_v46 = vsub.f32 0.0, %v1724_v44  ;;  %v3880_v43 = vld [vmem:[%s4788_s10 + $0x44] ss:$8 sps:$4 sm:$0xff]  }
 0x3b9   : > { %v3878_v44 = vld [vmem:[%s4788_s10 + $0x40] ss:$8 sps:$4 sm:$0xff]  }
 0x3ba   : > { %4050 = vpow2.f32 %v1727_v45  ;;  %v1729_v47 = vmul.f32 1.442695, %v1726_v46  ;;  %v3883_v45 = vld [vmem:[%s4788_s10 + $0x54] ss:$8 sps:$4 sm:$0xff]   ;;  %v3881_v46 = vld [vmem:[%s4788_s10 + $0x50] ss:$8 sps:$4 sm:$0xff]  }
 0x3bc   : > { %4052 = vpow2.f32 %v1729_v47  ;;  %v3886_v47 = vld [vmem:[%s4788_s10 + $0x64] ss:$8 sps:$4 sm:$0xff]  }
 0x3c4   : > { %v4051_v48 = vpop.eup %4050 }
 0x3c5   : > { %v1731_v49 = vadd.f32 1.0, %v4051_v48  ;;  %v1734_v53 = vmul.f32 -0.5, %v4051_v48  ;;  %v1737_v56 = vand.u32 2147483647, %v4051_v48 }
 0x3c6   : > { %v4053_v50 = vpop.eup %4052 }
 0x3c7   : > { %v1740_v52 = vadd.f32 1.0, %v4053_v50  ;;  %4054 = vlog2.f32 %v1731_v49  ;;  %v1743_v54 = vmul.f32 -0.5, %v4053_v50  ;;  %v1735_v55 = vadd.f32 1.0, %v1734_v53  ;;  %v3889_v49 = vld [vmem:[%s4788_s10 + $0x74] ss:$8 sps:$4 sm:$0xff]  }
 0x3c8   : > { %v1746_v60 = vand.u32 2147483647, %v4053_v50  ;;  %vm1738_vm2 = vcmp.lt.f32.partialorder %v1737_v56, 0.0004427343  ;;  %v3893_v53 = vld [vmem:[#allocation5 + $0x10] ss:$28 sps:$4 sm:$0xff]  }
 0x3c9   : > { %4056 = vlog2.f32 %v1740_v52  ;;  %v1744_v57 = vadd.f32 1.0, %v1743_v54  ;;  %v1736_v62 = vmul.f32 %v4051_v48, %v1735_v55  ;;  %v3884_v48 = vld [vmem:[%s4788_s10 + $0x60] ss:$8 sps:$4 sm:$0xff]   ;;  %v3892_v52 = vld [vmem:[#allocation5 + $0x4] ss:$28 sps:$4 sm:$0xff]  }
 0x3ca   : > { %vm1747_vm3 = vcmp.lt.f32.partialorder %v1746_v60, 0.0004427343  ;;  %v3895_v54 = vld [vmem:[#allocation5 + $0x14] ss:$28 sps:$4 sm:$0xff]   ;;  %v3899_v55 = vld [vmem:[#allocation5 + $0x48] ss:$28 sps:$4 sm:$0xff]  }
 0x3cb   : > { %v1745_v2 = vmul.f32 %v4053_v50, %v1744_v57  ;;  %v3887_v50 = vld [vmem:[%s4788_s10 + $0x70] ss:$8 sps:$4 sm:$0xff]   ;;  %2856 = vmatprep.subr.bf16.mxu0 %v3895_v54  ;;  %v3911_v60 = vld [vmem:[#allocation5 + $0xb8] ss:$28 sps:$4 sm:$0xff]  }
 0x3cc   : > { %2857 = vmatpush1.bf16.msra.mxu0 %v3893_v53  ;;  %v3901_v56 = vld [vmem:[#allocation5 + $0x4c] ss:$28 sps:$4 sm:$0xff]   ;;  %v3905_v57 = vld [vmem:[#allocation5 + $0x80] ss:$28 sps:$4 sm:$0xff]  }
 0x3cd   : > { %2858 = vmatprep.subr.bf16.mxu0 %v3901_v56  ;;  %v3958_v53 = vld [vmem:[#allocation5 + $0x26c] ss:$28 sps:$4 sm:$0xff]   ;;  %v3962_v56 = vld [vmem:[#allocation5 + $0x2a0] ss:$28 sps:$4 sm:$0xff]  }
 0x3ce   : > { %v3956_v54 = vld [vmem:[#allocation5 + $0x268] ss:$28 sps:$4 sm:$0xff]  }
 0x3d0   : > { %2859 = vmatpush1.bf16.msra.mxu0 %v3899_v55  ;;  %v3964_v55 = vld [vmem:[#allocation5 + $0x2a4] ss:$28 sps:$4 sm:$0xff]  }
 0x3d1   : > { %v4055_v59 = vpop.eup %4054 }
 0x3d2   : > { %v1733_v61 = vmul.f32 0.6931472, %v4055_v59  ;;  %v3907_v59 = vld [vmem:[#allocation5 + $0x84] ss:$28 sps:$4 sm:$0xff]  }
 0x3d3   : > { %v4057_v63 = vpop.eup %4056  ;;  %2860 = vmatprep.subr.bf16.mxu0 %v3907_v59  ;;  %v3968_v59 = vld [vmem:[#allocation5 + $0x2d8] ss:$28 sps:$4 sm:$0xff]  }
 0x3d4   : > { %v1742_v1 = vmul.f32 0.6931472, %v4057_v63  ;;  %v1739_v3 = vsel %vm1738_vm2, %v1736_v62, %v1733_v61  ;;  %2861 = vmatpush1.bf16.msra.mxu0 %v3905_v57  ;;  %v3913_v61 = vld [vmem:[#allocation5 + $0xbc] ss:$28 sps:$4 sm:$0xff]   ;;  %v3917_v62 = vld [vmem:[#allocation5 + $0xf0] ss:$28 sps:$4 sm:$0xff]  }
 0x3d5   : > { %v1749_v5 = vadd.f32 %v1739_v3, %v1721_v0  ;;  %2862 = vmatprep.subr.bf16.mxu0 %v3913_v61  ;;  %v3919_v63 = vld [vmem:[#allocation5 + $0xf4] ss:$28 sps:$4 sm:$0xff]   ;;  %v3923_v0 = vld [vmem:[#allocation5 + $0x128] ss:$28 sps:$4 sm:$0xff]   ;;  %v3970_v57 = vld [vmem:[#allocation5 + $0x2dc] ss:$28 sps:$4 sm:$0xff]  }
 0x3d6   : > { %v1748_v6 = vsel %vm1747_vm3, %v1745_v2, %v1742_v1  ;;  %v3925_v1 = vld [vmem:[#allocation5 + $0x12c] ss:$28 sps:$4 sm:$0xff]   ;;  %v3929_v2 = vld [vmem:[#allocation5 + $0x160] ss:$28 sps:$4 sm:$0xff]  }
 0x3d7   : > { %v1750_v7 = vadd.f32 %v1748_v6, %v1722_v4  ;;  %1787 = vrot.lane.b32.xlu0 %v1749_v5, %s4256_s17  ;;  %v1753_v8 = vmul.f32 0.5, %v1749_v5  ;;  %v3931_v3 = vld [vmem:[#allocation5 + $0x164] ss:$28 sps:$4 sm:$0xff]   ;;  %v3935_v4 = vld [vmem:[#allocation5 + $0x198] ss:$28 sps:$4 sm:$0xff]  }
 0x3d8   : > { %2863 = vmatpush1.bf16.msra.mxu0 %v3911_v60  ;;  %v3937_v5 = vld [vmem:[#allocation5 + $0x19c] ss:$28 sps:$4 sm:$0xff]   ;;  %v3941_v6 = vld [vmem:[#allocation5 + $0x1d0] ss:$28 sps:$4 sm:$0xff]  }
 0x3d9   : > { %v1754_v9 = vmul.f32 0.5, %v1750_v7  ;;  %v1755_v10 = vmul.f32 1.442695, %v1753_v8  ;;  %2864 = vmatprep.subr.bf16.mxu0 %v3919_v63  ;;  %v3947_v8 = vld [vmem:[#allocation5 + $0x208] ss:$28 sps:$4 sm:$0xff]  }
 0x3da   : > { %v3976_v60 = vld [vmem:[#allocation5 + $0x314] ss:$28 sps:$4 sm:$0xff]   ;;  %v3977_v63 = vld [vmem:[#allocation5 + $0x320] ss:$28 sps:$4 sm:$0xff]  }
 0x3db   : > { %v1757_v11 = vmul.f32 1.442695, %v1754_v9  ;;  %4058 = vpow2.f32 %v1755_v10  ;;  %v3949_v9 = vld [vmem:[#allocation5 + $0x20c] ss:$28 sps:$4 sm:$0xff]   ;;  %v3953_v10 = vld [vmem:[#allocation5 + $0x240] ss:$28 sps:$4 sm:$0xff]  }
 0x3dc   : > { %2865 = vmatpush1.bf16.msra.mxu0 %v3917_v62  ;;  %v3974_v61 = vld [vmem:[#allocation5 + $0x310] ss:$28 sps:$4 sm:$0xff]   ;;  %v3979_v62 = vld [vmem:[#allocation5 + $0x324] ss:$28 sps:$4 sm:$0xff]  }
 0x3dd   : > { %4060 = vpow2.f32 %v1757_v11  ;;  %2866 = vmatprep.subr.bf16.mxu0 %v3925_v1  ;;  %v3955_v11 = vld [vmem:[#allocation5 + $0x244] ss:$28 sps:$4 sm:$0xff]  }
 0x3de   : > { %v3980_v1 = vld [vmem:[#allocation5 + $0x348] ss:$28 sps:$4 sm:$0xff]  }
 0x3e0   : > { %2867 = vmatpush1.bf16.msra.mxu0 %v3923_v0  ;;  %v3982_v0 = vld [vmem:[#allocation5 + $0x34c] ss:$28 sps:$4 sm:$0xff]  }
 0x3e1   : > { %2868 = vmatprep.subr.bf16.mxu0 %v3931_v3  ;;  %v3983_v3 = vld [vmem:[#allocation5 + $0x358] ss:$28 sps:$4 sm:$0xff]  }
 0x3e4   : > { %2869 = vmatpush1.bf16.msra.mxu0 %v3929_v2  ;;  %v3985_v2 = vld [vmem:[#allocation5 + $0x35c] ss:$28 sps:$4 sm:$0xff]  }
 0x3e5   : > { %v4059_v15 = vpop.eup %4058  ;;  %2870 = vmatprep.subr.bf16.mxu0 %v3937_v5  ;;  %v1890_v5 = vlaneseq }
 0x3e6   : > { %v1767_v16 = vmul.f32 %v4059_v15, %v1762_v14  ;;  %v3965_v14 = vld [vmem:[#allocation5 + $0x2b0] ss:$28 sps:$4 sm:$0xff]  }
 0x3e7   : > { %v4061_v17 = vpop.eup %4060  ;;  %v3967_v15 = vld [vmem:[#allocation5 + $0x2b4] ss:$28 sps:$4 sm:$0xff]  }
 0x3e8   : > { %1771 = vrot.lane.b32.xlu1 %v1767_v16, %s4256_s17  ;;  %v1768_v19 = vmul.f32 %v4061_v17, %v1764_v18  ;;  %2871 = vmatpush1.bf16.msra.mxu0 %v3935_v4  ;;  %v3971_v18 = vld [vmem:[#allocation5 + $0x2e8] ss:$28 sps:$4 sm:$0xff]  }
 0x3e9   : > { %v3988_v4 = vld [vmem:[#allocation5 + $0xc] ss:$28 sps:$4 sm:$0xff]  }
 0x3ec   : > { %1773 = vrot.lane.b32.xlu1 %v1768_v19, %s4256_s17  ;;  %v3973_v19 = vld [vmem:[#allocation5 + $0x2ec] ss:$28 sps:$4 sm:$0xff]  }
 0x3f0   : > { %1789 = vrot.lane.b32.xlu1 %v1750_v7, %s4256_s17  ;;  %v3943_v7 = vld [vmem:[#allocation5 + $0x1d4] ss:$28 sps:$4 sm:$0xff]   ;;  %s603_s17 = scalar_lea.vmem %s4781_s3, %s4565_s26  ;;  %s4737_s26 = scalar_lea.sflag [#allocation4], %s569_s23 }
 0x3f1   : > { %2872 = vmatprep.subr.bf16.mxu0 %v3943_v7 }
 0x3f2   : > { %2873 = vmatpush1.bf16.msra.mxu0 %v3941_v6  ;;  %v4663_v6 = vshrl.u32 %v1890_v5, 7  ;;  %v4046_v5 = vld [vmem:[#allocation5 + $0x328] ss:$28 sps:$4 sm:$0xff]  }
 0x3f3   : > { %2874 = vmatprep.subr.bf16.mxu0 %v3949_v9 }
 0x3f4   : > { %v1892_v7 = vsub.s32 0, %v4663_v6  ;;  %v1896_v9 = vsub.s32 1, %v4663_v6 }
 0x3f6   : > { %2875 = vmatpush1.bf16.msra.mxu0 %v3947_v8  ;;  %v1888_v8 = vld [vmem:[%s4789_s11] sm:$0x3] }
 0x3f7   : > { %2876 = vmatprep.subr.bf16.mxu0 %v3955_v11  ;;  %v1897_v11 = vrot.slane %v1888_v8, %v1896_v9 }
 0x3fa   : > { %2877 = vmatpush1.bf16.msra.mxu0 %v3953_v10  ;;  %v1893_v10 = vrot.slane %v1888_v8, %v1892_v7  ;;  %v4047_v8 = vld [vmem:[#allocation5 + $0x168] ss:$28 sps:$4 sm:$0xff]  }
 0x3fb   : > { %2878 = vmatprep.subr.bf16.mxu0 %v3961_v13 }
 0x3fe   : > { %2879 = vmatpush1.bf16.msra.mxu0 %v3959_v12 }
 0x3ff   : > { %2880 = vmatprep.subr.bf16.mxu0 %v3967_v15 }
 0x402   : > { %2881 = vmatpush1.bf16.msra.mxu0 %v3965_v14 }
 0x403   : > { %2882 = vmatprep.subr.bf16.mxu0 %v3973_v19 }
 0x406   : > { %2883 = vmatpush1.bf16.msra.mxu0 %v3971_v18 }
 0x407   : > { %2884 = vmatprep.subr.bf16.mxu0 %v3979_v62  ;;  %v4039_v62 = vld [vmem:[#allocation5 + $0x88] ss:$28 sps:$4 sm:$0xff]  }
 0x40a   : > { %2885 = vmatpush1.bf16.msra.mxu0 %v3977_v63  ;;  %v4040_v63 = vld [vmem:[#allocation5 + $0x280] ss:$28 sps:$4 sm:$0xff]  }
 0x40b   : > { %2886 = vmatprep.subr.bf16.mxu0 %v3985_v2  ;;  %v4043_v2 = vld [vmem:[#allocation5 + $0xf8] ss:$28 sps:$4 sm:$0xff]  }
 0x40e   : > { %2887 = vmatpush1.bf16.msra.mxu0 %v3983_v3  ;;  %v4044_v3 = vld [vmem:[#allocation5 + $0x2f0] ss:$28 sps:$4 sm:$0xff]  }
 0x449   : > { %v1788_v29 = vpop.permute.xlu0 %1787 }
 0x45a   : > { %v1772_v20 = vpop.permute.xlu1 %1771 }
 0x45b   : > { %v1777_v58 = vadd.f32 %v1772_v20, %v4585_v37  ;;  %v3868_v37 = vld [vmem:[%s4788_s10 + $0x4] ss:$8 sps:$4 sm:$0xff]  }
 0x45c   : > { %1980 = vmatprep.subr.bf16.mxu1 %v3868_v37  ;;  %v3910_v37 = vld [vmem:[#allocation5 + $0xac] ss:$28 sps:$4 sm:$0xff]  }
 0x45d   : > { %v1779_v24 = vmul.f32 %v1777_v58, %v1777_v58 }
 0x45e   : > { %v1774_v25 = vpop.permute.xlu1 %1773 }
 0x45f   : > { %v1778_v27 = vadd.f32 %v1774_v25, %v4588_v41  ;;  %v1783_v28 = vsub.f32 %v1779_v24, %v1781_v23  ;;  %v3877_v41 = vld [vmem:[%s4788_s10 + $0x34] ss:$8 sps:$4 sm:$0xff]   ;;  %v1812_v25 = vld [vmem:[%s603_s17 + $0x8] sm:$0xff] }
 0x461   : > { %v1780_v30 = vmul.f32 %v1778_v27, %v1778_v27  ;;  %v1806_v31 = vpack.c.bf16 %v1778_v27, %v1777_v58  ;;  %v1793_v32 = vsub.f32 %v1783_v28, %v1788_v29  ;;  %v1811_v58 = vld [vmem:[%s603_s17] sm:$0xff]  ;;  %s4732_s17 = scalar_lea.hbm %s4828_s25, %s3611_s29 }
 0x462   : > { %v1790_v35 = vpop.permute.xlu1 %1789 }
 0x463   : > { %v1784_v33 = vsub.f32 %v1780_v30, %v1782_v26  ;;  %3590 = vmatmul.mubr.msk.bf16.vlgmr.msra.gmra.mrb[8].mxu1 %vm1795_vm4, %v1806_v31  ;;  %v1796_v34 = vsel %vm1795_vm4, %v1793_v32, 0.0 }
 0x464   : > { %1797 = vadd.xlane.f32.xlu0 %v1796_v34  ;;  %2012 = vmatprep.mubr.bf16.mxu1 %v4252_v51  ;;  %v3869_v51 = vld [vmem:[%s4788_s10 + $0x10] ss:$8 sps:$4 sm:$0xff]  }
 0x465   : > { %v1794_v21 = vsub.f32 %v1784_v33, %v1790_v35  ;;  %1981 = vmatpush1.bf16.msra.mxu1 %v3866_v22  ;;  %v3890_v33 = vld [vmem:[#allocation5] ss:$28 sps:$4 sm:$0xff]   ;;  %v3902_v22 = vld [vmem:[#allocation5 + $0x70] ss:$28 sps:$4 sm:$0xff]  }
 0x466   : > { %1982 = vmatprep.subr.bf16.mxu1 %v3871_v38  ;;  %v3898_v35 = vld [vmem:[#allocation5 + $0x3c] ss:$28 sps:$4 sm:$0xff]   ;;  %v3908_v38 = vld [vmem:[#allocation5 + $0xa8] ss:$28 sps:$4 sm:$0xff]  }
 0x467   : > { %v1799_v36 = vsel %vm1795_vm4, %v1794_v21, 0.0  ;;  %v3896_v21 = vld [vmem:[#allocation5 + $0x38] ss:$28 sps:$4 sm:$0xff]  }
 0x468   : > { %1800 = vadd.xlane.f32.xlu1 %v1799_v36  ;;  %v3904_v36 = vld [vmem:[#allocation5 + $0x74] ss:$28 sps:$4 sm:$0xff]  }
 0x469   : > { %1983 = vmatpush1.bf16.msra.mxu1 %v3869_v51  ;;  %v3916_v51 = vld [vmem:[#allocation5 + $0xe4] ss:$28 sps:$4 sm:$0xff]  }
 0x46a   : > { %1984 = vmatprep.subr.bf16.mxu1 %v3874_v39  ;;  %v3914_v39 = vld [vmem:[#allocation5 + $0xe0] ss:$28 sps:$4 sm:$0xff]  }
 0x46d   : > { %1985 = vmatpush1.bf16.msra.mxu1 %v3872_v40  ;;  %v3922_v40 = vld [vmem:[#allocation5 + $0x11c] ss:$28 sps:$4 sm:$0xff]  }
 0x46e   : > { %1986 = vmatprep.subr.bf16.mxu1 %v3877_v41  ;;  %v3920_v41 = vld [vmem:[#allocation5 + $0x118] ss:$28 sps:$4 sm:$0xff]  }
 0x471   : > { %1987 = vmatpush1.bf16.msra.mxu1 %v3875_v42  ;;  %v3928_v42 = vld [vmem:[#allocation5 + $0x154] ss:$28 sps:$4 sm:$0xff]  }
 0x472   : > { %1988 = vmatprep.subr.bf16.mxu1 %v3880_v43  ;;  %v3926_v43 = vld [vmem:[#allocation5 + $0x150] ss:$28 sps:$4 sm:$0xff]  }
 0x475   : > { %1989 = vmatpush1.bf16.msra.mxu1 %v3878_v44  ;;  %v3934_v44 = vld [vmem:[#allocation5 + $0x18c] ss:$28 sps:$4 sm:$0xff]  }
 0x476   : > { %1990 = vmatprep.subr.bf16.mxu1 %v3883_v45  ;;  %v3932_v45 = vld [vmem:[#allocation5 + $0x188] ss:$28 sps:$4 sm:$0xff]  }
 0x479   : > { %1991 = vmatpush1.bf16.msra.mxu1 %v3881_v46  ;;  %v3940_v46 = vld [vmem:[#allocation5 + $0x1c4] ss:$28 sps:$4 sm:$0xff]  }
 0x47a   : > { %1992 = vmatprep.subr.bf16.mxu1 %v3886_v47  ;;  %v3938_v47 = vld [vmem:[#allocation5 + $0x1c0] ss:$28 sps:$4 sm:$0xff]  }
 0x47d   : > { %1993 = vmatpush1.bf16.msra.mxu1 %v3884_v48  ;;  %v3946_v48 = vld [vmem:[#allocation5 + $0x1fc] ss:$28 sps:$4 sm:$0xff]  }
 0x47e   : > { %1994 = vmatprep.subr.bf16.mxu1 %v3889_v49  ;;  %v3944_v49 = vld [vmem:[#allocation5 + $0x1f8] ss:$28 sps:$4 sm:$0xff]  }
 0x481   : > { %1995 = vmatpush1.bf16.msra.mxu1 %v3887_v50  ;;  %v3952_v50 = vld [vmem:[#allocation5 + $0x234] ss:$28 sps:$4 sm:$0xff]  }
 0x482   : > { %2770 = vmatprep.subr.bf16.mxu1 %v3892_v52  ;;  %v3950_v52 = vld [vmem:[#allocation5 + $0x230] ss:$28 sps:$4 sm:$0xff]  }
 0x4f1   : > { %v1798_v16 = vpop.xlane.xlu0 %1797 }
 0x4f2   : > { %v1802_v17 = vmul.f32 0.5, %v1798_v16 }
 0x4f4   : > { %1804 = vst [vmem:[%s610_s18] sm:$0xff] %v1802_v17 }
 0x4f5   : > { %v1801_v20 = vpop.xlane.xlu1 %1800 }
 0x4f6   : > { %v1803_v23 = vmul.f32 0.5, %v1801_v20 }
 0x4f8   : > { %1805 = vst [vmem:[%s610_s18 + $0x8] sm:$0xff] %v1803_v23 }
 0x536   : > { %v1862_v24 = vpop.f32.mrb[8].mxu1 }
 0x537   : > { %v1863_v26 = vadd.f32 %v1862_v24, %v1811_v58  ;;  %v3591_v27 = vpop.f32.mrb[9].mxu1 }
 0x538   : > { %v1865_v28 = vpop.f32.mrb[10].mxu1  ;;  %v3986_v27 = vld [vmem:[#allocation5 + $0x8] ss:$28 sps:$4 sm:$0xff]  }
 0x539   : > { %v1866_v29 = vadd.f32 %v1865_v28, %v1812_v25  ;;  %v3592_v30 = vpop.f32.mrb[11].mxu1  ;;  %v1869_v31 = vmax.f32 %v1863_v26, 0.0  ;;  %v3991_v28 = vld [vmem:[#allocation5 + $0x44] ss:$28 sps:$4 sm:$0xff]  }
 0x53a   : > { %v3994_v30 = vld [vmem:[#allocation5 + $0x7c] ss:$28 sps:$4 sm:$0xff]  }
 0x53b   : > { %v1870_v32 = vmax.f32 %v1866_v29, 0.0  ;;  %v3989_v29 = vld [vmem:[#allocation5 + $0x40] ss:$28 sps:$4 sm:$0xff]  }
 0x53d   : > { %v1871_v34 = vpack.c.bf16 %v1870_v32, %v1869_v31  ;;  %v3992_v31 = vld [vmem:[#allocation5 + $0x78] ss:$28 sps:$4 sm:$0xff]  }
 0x53e   : > { %v3997_v32 = vld [vmem:[#allocation5 + $0xb4] ss:$28 sps:$4 sm:$0xff]  }
 0x53f   : > { %2013 = vmatmul.mubr.bf16.vlgmr.msra.gmra.mrb[12].mxu1 %v1871_v34  ;;  %v4000_v34 = vld [vmem:[#allocation5 + $0xec] ss:$28 sps:$4 sm:$0xff]  }
 0x540   : > { %2771 = vmatpush1.bf16.msra.mxu1 %v3890_v33  ;;  %v3995_v33 = vld [vmem:[#allocation5 + $0xb0] ss:$28 sps:$4 sm:$0xff]  }
 0x541   : > { %2772 = vmatprep.subr.bf16.mxu1 %v3898_v35  ;;  %v3998_v35 = vld [vmem:[#allocation5 + $0xe8] ss:$28 sps:$4 sm:$0xff]  }
 0x544   : > { %2773 = vmatpush1.bf16.msra.mxu1 %v3896_v21  ;;  %v4003_v21 = vld [vmem:[#allocation5 + $0x124] ss:$28 sps:$4 sm:$0xff]  }
 0x545   : > { %2774 = vmatprep.subr.bf16.mxu1 %v3904_v36  ;;  %v4001_v36 = vld [vmem:[#allocation5 + $0x120] ss:$28 sps:$4 sm:$0xff]  }
 0x548   : > { %2775 = vmatpush1.bf16.msra.mxu1 %v3902_v22  ;;  %v4006_v22 = vld [vmem:[#allocation5 + $0x15c] ss:$28 sps:$4 sm:$0xff]  }
 0x549   : > { %2776 = vmatprep.subr.bf16.mxu1 %v3910_v37  ;;  %v4004_v37 = vld [vmem:[#allocation5 + $0x158] ss:$28 sps:$4 sm:$0xff]  }
 0x54c   : > { %2777 = vmatpush1.bf16.msra.mxu1 %v3908_v38  ;;  %v4009_v38 = vld [vmem:[#allocation5 + $0x194] ss:$28 sps:$4 sm:$0xff]  }
 0x54d   : > { %2778 = vmatprep.subr.bf16.mxu1 %v3916_v51  ;;  %v4007_v51 = vld [vmem:[#allocation5 + $0x190] ss:$28 sps:$4 sm:$0xff]  }
 0x550   : > { %2779 = vmatpush1.bf16.msra.mxu1 %v3914_v39  ;;  %v4012_v39 = vld [vmem:[#allocation5 + $0x1cc] ss:$28 sps:$4 sm:$0xff]  }
 0x551   : > { %2780 = vmatprep.subr.bf16.mxu1 %v3922_v40  ;;  %v4010_v40 = vld [vmem:[#allocation5 + $0x1c8] ss:$28 sps:$4 sm:$0xff]  }
 0x554   : > { %2781 = vmatpush1.bf16.msra.mxu1 %v3920_v41  ;;  %v4015_v41 = vld [vmem:[#allocation5 + $0x204] ss:$28 sps:$4 sm:$0xff]  }
 0x555   : > { %2782 = vmatprep.subr.bf16.mxu1 %v3928_v42  ;;  %v4013_v42 = vld [vmem:[#allocation5 + $0x200] ss:$28 sps:$4 sm:$0xff]  }
 0x558   : > { %2783 = vmatpush1.bf16.msra.mxu1 %v3926_v43  ;;  %v4018_v43 = vld [vmem:[#allocation5 + $0x23c] ss:$28 sps:$4 sm:$0xff]  }
 0x559   : > { %2784 = vmatprep.subr.bf16.mxu1 %v3934_v44  ;;  %v4016_v44 = vld [vmem:[#allocation5 + $0x238] ss:$28 sps:$4 sm:$0xff]  }
 0x55c   : > { %2785 = vmatpush1.bf16.msra.mxu1 %v3932_v45  ;;  %v4021_v45 = vld [vmem:[#allocation5 + $0x274] ss:$28 sps:$4 sm:$0xff]  }
 0x55d   : > { %2786 = vmatprep.subr.bf16.mxu1 %v3940_v46  ;;  %v4019_v46 = vld [vmem:[#allocation5 + $0x270] ss:$28 sps:$4 sm:$0xff]  }
 0x560   : > { %2787 = vmatpush1.bf16.msra.mxu1 %v3938_v47  ;;  %v4024_v47 = vld [vmem:[#allocation5 + $0x2ac] ss:$28 sps:$4 sm:$0xff]  }
 0x561   : > { %2788 = vmatprep.subr.bf16.mxu1 %v3946_v48  ;;  %v4022_v48 = vld [vmem:[#allocation5 + $0x2a8] ss:$28 sps:$4 sm:$0xff]  }
 0x564   : > { %2789 = vmatpush1.bf16.msra.mxu1 %v3944_v49  ;;  %v4027_v49 = vld [vmem:[#allocation5 + $0x2e4] ss:$28 sps:$4 sm:$0xff]  }
 0x565   : > { %2790 = vmatprep.subr.bf16.mxu1 %v3952_v50  ;;  %v4025_v50 = vld [vmem:[#allocation5 + $0x2e0] ss:$28 sps:$4 sm:$0xff]  }
 0x568   : > { %2791 = vmatpush1.bf16.msra.mxu1 %v3950_v52  ;;  %v4030_v52 = vld [vmem:[#allocation5 + $0x31c] ss:$28 sps:$4 sm:$0xff]  }
 0x569   : > { %2792 = vmatprep.subr.bf16.mxu1 %v3958_v53  ;;  %v4028_v53 = vld [vmem:[#allocation5 + $0x318] ss:$28 sps:$4 sm:$0xff]  }
 0x56c   : > { %2793 = vmatpush1.bf16.msra.mxu1 %v3956_v54  ;;  %v4033_v54 = vld [vmem:[#allocation5 + $0x354] ss:$28 sps:$4 sm:$0xff]  }
 0x56d   : > { %2794 = vmatprep.subr.bf16.mxu1 %v3964_v55  ;;  %v4031_v55 = vld [vmem:[#allocation5 + $0x350] ss:$28 sps:$4 sm:$0xff]  }
 0x570   : > { %2795 = vmatpush1.bf16.msra.mxu1 %v3962_v56  ;;  %v4034_v56 = vld [vmem:[#allocation5 + $0x1d8] ss:$28 sps:$4 sm:$0xff]  }
 0x571   : > { %2796 = vmatprep.subr.bf16.mxu1 %v3970_v57  ;;  %v4035_v57 = vld [vmem:[#allocation5 + $0x18] ss:$28 sps:$4 sm:$0xff]  }
 0x574   : > { %2797 = vmatpush1.bf16.msra.mxu1 %v3968_v59  ;;  %v4036_v59 = vld [vmem:[#allocation5 + $0x210] ss:$28 sps:$4 sm:$0xff]  }
 0x575   : > { %2798 = vmatprep.subr.bf16.mxu1 %v3976_v60  ;;  %v4037_v60 = vld [vmem:[#allocation5 + $0x50] ss:$28 sps:$4 sm:$0xff]  }
 0x578   : > { %2799 = vmatpush1.bf16.msra.mxu1 %v3974_v61  ;;  %v4038_v61 = vld [vmem:[#allocation5 + $0x248] ss:$28 sps:$4 sm:$0xff]  }
 0x579   : > { %2800 = vmatprep.subr.bf16.mxu1 %v3982_v0  ;;  %v4041_v0 = vld [vmem:[#allocation5 + $0xc0] ss:$28 sps:$4 sm:$0xff]  }
 0x57c   : > { %2801 = vmatpush1.bf16.msra.mxu1 %v3980_v1  ;;  %v4042_v1 = vld [vmem:[#allocation5 + $0x2b8] ss:$28 sps:$4 sm:$0xff]  }
 0x57d   : > { %2813 = vmatprep.subr.bf16.mxu1 %v3988_v4  ;;  %v4045_v4 = vld [vmem:[#allocation5 + $0x130] ss:$28 sps:$4 sm:$0xff]  }
 0x612   : > { %v2014_v12 = vpop.f32.mrb[12].mxu1 }
 0x613   : > { %v2015_v13 = vadd.f32 %v2014_v12, %v1893_v10  ;;  %v2016_v14 = vpop.f32.mrb[13].mxu1  ;;  %v2177_v12 = vsub.s32 4, %v4663_v6 }
 0x614   : > { %v2017_v15 = vadd.f32 %v2016_v14, %v1897_v11  ;;  %v2018_v16 = vpop.f32.mrb[14].mxu1  ;;  %v2181_v14 = vsub.s32 5, %v4663_v6 }
 0x615   : > { %v2019_v17 = vadd.f32 %v2018_v16, %v1893_v10  ;;  %v2020_v18 = vpop.f32.mrb[15].mxu1  ;;  %v2023_v20 = vmax.f32 %v2015_v13, 0.0  ;;  %v4048_v10 = vld [vmem:[#allocation5 + $0x360] ss:$28 sps:$4 sm:$0xff]   ;;  %v4690_v13 = vld [vmem:[%s4791_s13] sm:$0xff] }
 0x616   : > { %v2021_v19 = vadd.f32 %v2020_v18, %v1897_v11  ;;  %v2024_v58 = vmax.f32 %v2017_v15, 0.0  ;;  %v4049_v11 = vld [vmem:[#allocation5 + $0x1a0] ss:$28 sps:$4 sm:$0xff]   ;;  %v2162_v15 = vrot.slane %v4690_v13, %v1892_v7  ;;  %v2178_v16 = vrot.slane %v4690_v13, %v2177_v12 }
 0x617   : > { %v2025_v23 = vmax.f32 %v2019_v17, 0.0  ;;  %v2166_v17 = vrot.slane %v4690_v13, %v1896_v9  ;;  %v2182_v18 = vrot.slane %v4690_v13, %v2181_v14 }
 0x618   : > { %v2026_v24 = vmax.f32 %v2021_v19, 0.0 }
 0x619   : > { %v4674_v25 = vpack.c.bf16 %v2025_v23, %v2023_v20 }
 0x61a   : > { %v4676_v26 = vpack.c.bf16 %v2026_v24, %v2024_v58 }
 0x61c   : > { %2802 = vmatprep.mubr.bf16.mxu1 %v4676_v26  ;;  %2888 = vmatprep.mubr.bf16.mxu0 %v4676_v26 }
 0x61d   : > { %2803 = vmatmul.mubr.bf16.vlgmr.msra.gmra.mrb[16].mxu1 %v4674_v25  ;;  %2889 = vmatmul.mubr.bf16.vlgmr.msra.gmra.mrb[4].mxu0 %v4674_v25 }
 0x61e   : > { %2814 = vmatpush1.bf16.msra.mxu1 %v3986_v27  ;;  %2845 = vmatprep.mubr.bf16.mxu1 %v4676_v26 }
 0x61f   : > { %2815 = vmatprep.subr.bf16.mxu1 %v3991_v28 }
 0x622   : > { %2816 = vmatpush1.bf16.msra.mxu1 %v3989_v29 }
 0x623   : > { %2817 = vmatprep.subr.bf16.mxu1 %v3994_v30 }
 0x626   : > { %2818 = vmatpush1.bf16.msra.mxu1 %v3992_v31 }
 0x627   : > { %2819 = vmatprep.subr.bf16.mxu1 %v3997_v32 }
 0x62a   : > { %2820 = vmatpush1.bf16.msra.mxu1 %v3995_v33 }
 0x62b   : > { %2821 = vmatprep.subr.bf16.mxu1 %v4000_v34 }
 0x62e   : > { %2822 = vmatpush1.bf16.msra.mxu1 %v3998_v35 }
 0x62f   : > { %2823 = vmatprep.subr.bf16.mxu1 %v4003_v21 }
 0x632   : > { %2824 = vmatpush1.bf16.msra.mxu1 %v4001_v36 }
 0x633   : > { %2825 = vmatprep.subr.bf16.mxu1 %v4006_v22 }
 0x636   : > { %2826 = vmatpush1.bf16.msra.mxu1 %v4004_v37 }
 0x637   : > { %2827 = vmatprep.subr.bf16.mxu1 %v4009_v38 }
 0x63a   : > { %2828 = vmatpush1.bf16.msra.mxu1 %v4007_v51 }
 0x63b   : > { %2829 = vmatprep.subr.bf16.mxu1 %v4012_v39 }
 0x63e   : > { %2830 = vmatpush1.bf16.msra.mxu1 %v4010_v40 }
 0x63f   : > { %2831 = vmatprep.subr.bf16.mxu1 %v4015_v41 }
 0x642   : > { %2832 = vmatpush1.bf16.msra.mxu1 %v4013_v42 }
 0x643   : > { %2833 = vmatprep.subr.bf16.mxu1 %v4018_v43 }
 0x646   : > { %2834 = vmatpush1.bf16.msra.mxu1 %v4016_v44 }
 0x647   : > { %2835 = vmatprep.subr.bf16.mxu1 %v4021_v45 }
 0x64a   : > { %2836 = vmatpush1.bf16.msra.mxu1 %v4019_v46 }
 0x64b   : > { %2837 = vmatprep.subr.bf16.mxu1 %v4024_v47 }
 0x64e   : > { %2838 = vmatpush1.bf16.msra.mxu1 %v4022_v48 }
 0x64f   : > { %2839 = vmatprep.subr.bf16.mxu1 %v4027_v49 }
 0x652   : > { %2840 = vmatpush1.bf16.msra.mxu1 %v4025_v50 }
 0x653   : > { %2841 = vmatprep.subr.bf16.mxu1 %v4030_v52 }
 0x656   : > { %2842 = vmatpush1.bf16.msra.mxu1 %v4028_v53 }
 0x657   : > { %2843 = vmatprep.subr.bf16.mxu1 %v4033_v54 }
 0x65a   : > { %2844 = vmatpush1.bf16.msra.mxu1 %v4031_v55 }
 0x65b   : > { %3543 = vmatprep.subr.bf16.mxu1 %v4034_v56 }
 0x65d   : > { %2846 = vmatmul.mubr.bf16.vlgmr.msra.gmra.mrb[20].mxu1 %v4674_v25 }
 0x65e   : > { %3544 = vmatpush3.bf16.msra.mxu1 %v4035_v57  ;;  %2931 = vmatprep.mubr.bf16.mxu1 %v4676_v26 }
 0x65f   : > { %3545 = vmatprep.subr.bf16.mxu1 %v4036_v59 }
 0x662   : > { %3546 = vmatpush3.bf16.msra.mxu1 %v4037_v60 }
 0x663   : > { %3547 = vmatprep.subr.bf16.mxu1 %v4038_v61 }
 0x666   : > { %3548 = vmatpush3.bf16.msra.mxu1 %v4039_v62 }
 0x667   : > { %3549 = vmatprep.subr.bf16.mxu1 %v4040_v63 }
 0x66a   : > { %3550 = vmatpush3.bf16.msra.mxu1 %v4041_v0 }
 0x66b   : > { %3551 = vmatprep.subr.bf16.mxu1 %v4042_v1 }
 0x66e   : > { %3552 = vmatpush3.bf16.msra.mxu1 %v4043_v2 }
 0x66f   : > { %3553 = vmatprep.subr.bf16.mxu1 %v4044_v3 }
 0x672   : > { %3554 = vmatpush3.bf16.msra.mxu1 %v4045_v4 }
 0x673   : > { %3555 = vmatprep.subr.bf16.mxu1 %v4046_v5 }
 0x676   : > { %3556 = vmatpush3.bf16.msra.mxu1 %v4047_v8 }
 0x677   : > { %3557 = vmatprep.subr.bf16.mxu1 %v4048_v10 }
 0x67a   : > { %3558 = vmatpush3.bf16.msra.mxu1 %v4049_v11 }
 0x67d   : > { %2932 = vmatmul.mubr.bf16.vlgmr.msra.gmra.mrb[24].mxu1 %v4674_v25 }
 0x6f0   : > { %v2804_v19 = vpop.f32.mrb[16].mxu1  ;;  %v2890_v20 = vpop.f32.mrb[4].mxu0 }
 0x6f1   : > { %v2805_v23 = vadd.f32 %v2804_v19, %v2162_v15  ;;  %v2891_v58 = vadd.f32 %v2890_v20, %v2178_v16  ;;  %v2806_v24 = vpop.f32.mrb[17].mxu1  ;;  %v2892_v25 = vpop.f32.mrb[5].mxu0 }
 0x6f2   : > { %v2807_v26 = vadd.f32 %v2806_v24, %v2166_v17  ;;  %v2893_v27 = vadd.f32 %v2892_v25, %v2182_v18  ;;  %v2808_v28 = vpop.f32.mrb[18].mxu1  ;;  %v2894_v29 = vpop.f32.mrb[6].mxu0 }
 0x6f3   : > { %v2940_v30 = vsub.f32 0.0, %v2805_v23  ;;  %v2944_v7 = vsub.f32 0.0, %v2891_v58  ;;  %v2809_v31 = vadd.f32 %v2808_v28, %v2162_v15  ;;  %v2895_v32 = vadd.f32 %v2894_v29, %v2178_v16  ;;  %v2810_v33 = vpop.f32.mrb[19].mxu1  ;;  %v2896_v34 = vpop.f32.mrb[7].mxu0 }
 0x6f4   : > { %v2941_v35 = vsub.f32 0.0, %v2807_v26  ;;  %v2945_v9 = vsub.f32 0.0, %v2893_v27  ;;  %v2811_v21 = vadd.f32 %v2810_v33, %v2166_v17  ;;  %v2897_v36 = vadd.f32 %v2896_v34, %v2182_v18 }
 0x6f5   : > { %v2954_v22 = vmul.f32 1.442695, %v2940_v30  ;;  %v2962_v37 = vmul.f32 1.442695, %v2944_v7  ;;  %v2947_v38 = vsub.f32 0.0, %v2809_v31  ;;  %v2951_v51 = vsub.f32 0.0, %v2895_v32 }
 0x6f6   : > { %v2956_v39 = vmul.f32 1.442695, %v2941_v35  ;;  %v2964_v40 = vmul.f32 1.442695, %v2945_v9  ;;  %v2948_v41 = vsub.f32 0.0, %v2811_v21  ;;  %v2952_v42 = vsub.f32 0.0, %v2897_v36 }
 0x6f7   : > { %4062 = vpow2.f32 %v2954_v22  ;;  %v2968_v43 = vmul.f32 1.442695, %v2947_v38  ;;  %v2976_v44 = vmul.f32 1.442695, %v2951_v51  ;;  %v2169_v30 = vsub.s32 2, %v4663_v6 }
 0x6f8   : > { %4064 = vpow2.f32 %v2962_v37  ;;  %v2970_v45 = vmul.f32 1.442695, %v2948_v41  ;;  %v2978_v46 = vmul.f32 1.442695, %v2952_v42  ;;  %v2173_v7 = vsub.s32 3, %v4663_v6 }
 0x6f9   : > { %4066 = vpow2.f32 %v2956_v39  ;;  %v2170_v31 = vrot.slane %v4690_v13, %v2169_v30 }
 0x6fa   : > { %4068 = vpow2.f32 %v2964_v40  ;;  %v2174_v32 = vrot.slane %v4690_v13, %v2173_v7 }
 0x6fb   : > { %4070 = vpow2.f32 %v2968_v43 }
 0x6fc   : > { %4072 = vpow2.f32 %v2976_v44 }
 0x6fd   : > { %4074 = vpow2.f32 %v2970_v45 }
 0x6fe   : > { %4076 = vpow2.f32 %v2978_v46 }
 0x701   : > { %v4063_v47 = vpop.eup %4062 }
 0x702   : > { %v4065_v48 = vpop.eup %4064  ;;  %v2982_v49 = vadd.f32 1.0, %v4063_v47 }
 0x703   : > { %v4067_v50 = vpop.eup %4066  ;;  %v2986_v52 = vadd.f32 1.0, %v4065_v48 }
 0x704   : > { %v4069_v53 = vpop.eup %4068  ;;  %4078 = vrcp.f32 %v2982_v49  ;;  %v2983_v54 = vadd.f32 1.0, %v4067_v50 }
 0x705   : > { %v4071_v55 = vpop.eup %4070  ;;  %4080 = vrcp.f32 %v2986_v52  ;;  %v2987_v56 = vadd.f32 1.0, %v4069_v53 }
 0x706   : > { %v4073_v57 = vpop.eup %4072  ;;  %4082 = vrcp.f32 %v2983_v54  ;;  %v2989_v59 = vadd.f32 1.0, %v4071_v55  ;;  %v2185_v54 = vsub.s32 6, %v4663_v6 }
 0x707   : > { %v4075_v60 = vpop.eup %4074  ;;  %4084 = vrcp.f32 %v2987_v56  ;;  %v2993_v61 = vadd.f32 1.0, %v4073_v57 }
 0x708   : > { %v4077_v62 = vpop.eup %4076  ;;  %4086 = vrcp.f32 %v2989_v59  ;;  %v2990_v63 = vadd.f32 1.0, %v4075_v60 }
 0x709   : > { %4088 = vrcp.f32 %v2993_v61  ;;  %v2994_v0 = vadd.f32 1.0, %v4077_v62  ;;  %v2186_v62 = vrot.slane %v4690_v13, %v2185_v54 }
 0x70a   : > { %4090 = vrcp.f32 %v2990_v63 }
 0x70b   : > { %4092 = vrcp.f32 %v2994_v0 }
 0x70e   : > { %v4079_v1 = vpop.eup %4078 }
 0x70f   : > { %v4081_v2 = vpop.eup %4080  ;;  %v3010_v3 = vmax.f32 %v4079_v1, 0.0 }
 0x710   : > { %v4083_v4 = vpop.eup %4082  ;;  %v3014_v5 = vmax.f32 %v4081_v2, 0.0 }
 0x711   : > { %v4085_v8 = vpop.eup %4084  ;;  %v3024_v10 = vmin.f32 %v3010_v3, 1.0  ;;  %v3011_v11 = vmax.f32 %v4083_v4, 0.0 }
 0x712   : > { %v4087_v12 = vpop.eup %4086  ;;  %v3028_v14 = vmin.f32 %v3014_v5, 1.0  ;;  %v3015_v15 = vmax.f32 %v4085_v8, 0.0 }
 0x713   : > { %v4089_v16 = vpop.eup %4088  ;;  %3038 = vst [vmem:[%s4704_s21] sm:$0xff] %v3024_v10  ;;  %v3025_v17 = vmin.f32 %v3011_v11, 1.0  ;;  %v3017_v18 = vmax.f32 %v4087_v12, 0.0 }
 0x714   : > { %v4091_v19 = vpop.eup %4090  ;;  %3042 = vst [vmem:[%s4704_s21 + $0x20] sm:$0xff] %v3028_v14  ;;  %v3029_v20 = vmin.f32 %v3015_v15, 1.0  ;;  %v3021_v23 = vmax.f32 %v4089_v16, 0.0 }
 0x715   : > { %v4093_v58 = vpop.eup %4092  ;;  %3039 = vst [vmem:[%s4704_s21 + $0x8] sm:$0xff] %v3025_v17  ;;  %v3031_v24 = vmin.f32 %v3017_v18, 1.0  ;;  %v3018_v25 = vmax.f32 %v4091_v19, 0.0 }
 0x716   : > { %3043 = vst [vmem:[%s4704_s21 + $0x28] sm:$0xff] %v3029_v20  ;;  %v3035_v26 = vmin.f32 %v3021_v23, 1.0  ;;  %v3022_v27 = vmax.f32 %v4093_v58, 0.0 }
 0x717   : > { %3045 = vst [vmem:[%s4704_s21 + $0x38] sm:$0xff] %v3031_v24  ;;  %v3032_v28 = vmin.f32 %v3018_v25, 1.0 }
 0x718   : > { %3049 = vst [vmem:[%s4704_s21 + $0x58] sm:$0xff] %v3035_v26  ;;  %v3036_v29 = vmin.f32 %v3022_v27, 1.0 }
 0x719   : > { %3046 = vst [vmem:[%s4704_s21 + $0x40] sm:$0xff] %v3032_v28 }
 0x71a   : > { %3050 = vst [vmem:[%s4704_s21 + $0x60] sm:$0xff] %v3036_v29 }
 0x730   : > { %v2847_v33 = vpop.f32.mrb[20].mxu1 }
 0x731   : > { %v2848_v34 = vadd.f32 %v2847_v33, %v2170_v31  ;;  %v2849_v35 = vpop.f32.mrb[21].mxu1 }
 0x732   : > { %v2850_v9 = vadd.f32 %v2849_v35, %v2174_v32  ;;  %v2851_v21 = vpop.f32.mrb[22].mxu1 }
 0x733   : > { %v2942_v36 = vsub.f32 0.0, %v2848_v34  ;;  %v2852_v22 = vadd.f32 %v2851_v21, %v2170_v31  ;;  %v2853_v37 = vpop.f32.mrb[23].mxu1 }
 0x734   : > { %v2943_v38 = vsub.f32 0.0, %v2850_v9  ;;  %v2854_v51 = vadd.f32 %v2853_v37, %v2174_v32 }
 0x735   : > { %v2958_v39 = vmul.f32 1.442695, %v2942_v36  ;;  %v2949_v40 = vsub.f32 0.0, %v2852_v22 }
 0x736   : > { %v2960_v41 = vmul.f32 1.442695, %v2943_v38  ;;  %v2950_v42 = vsub.f32 0.0, %v2854_v51 }
 0x737   : > { %4094 = vpow2.f32 %v2958_v39  ;;  %v2972_v43 = vmul.f32 1.442695, %v2949_v40 }
 0x738   : > { %4096 = vpow2.f32 %v2960_v41  ;;  %v2974_v44 = vmul.f32 1.442695, %v2950_v42 }
 0x739   : > { %4098 = vpow2.f32 %v2972_v43 }
 0x73a   : > { %4100 = vpow2.f32 %v2974_v44 }
 0x741   : > { %v4095_v45 = vpop.eup %4094 }
 0x742   : > { %v4097_v46 = vpop.eup %4096  ;;  %v2984_v47 = vadd.f32 1.0, %v4095_v45 }
 0x743   : > { %v4099_v48 = vpop.eup %4098  ;;  %v2985_v49 = vadd.f32 1.0, %v4097_v46 }
 0x744   : > { %v4101_v50 = vpop.eup %4100  ;;  %4102 = vrcp.f32 %v2984_v47  ;;  %v2991_v52 = vadd.f32 1.0, %v4099_v48 }
 0x745   : > { %4104 = vrcp.f32 %v2985_v49  ;;  %v2992_v53 = vadd.f32 1.0, %v4101_v50 }
 0x746   : > { %4106 = vrcp.f32 %v2991_v52 }
 0x747   : > { %4108 = vrcp.f32 %v2992_v53 }
 0x74e   : > { %v4103_v55 = vpop.eup %4102 }
 0x74f   : > { %v4105_v56 = vpop.eup %4104  ;;  %v3012_v57 = vmax.f32 %v4103_v55, 0.0 }
 0x750   : > { %v4107_v59 = vpop.eup %4106  ;;  %v3013_v60 = vmax.f32 %v4105_v56, 0.0  ;;  %v3559_v61 = vpop.f32.mrb[24].mxu1 }
 0x751   : > { %v4109_v63 = vpop.eup %4108  ;;  %v3026_v0 = vmin.f32 %v3012_v57, 1.0  ;;  %v3019_v1 = vmax.f32 %v4107_v59, 0.0  ;;  %v3560_v2 = vpop.f32.mrb[25].mxu1 }
 0x752   : > { %v3027_v3 = vmin.f32 %v3013_v60, 1.0  ;;  %v3020_v4 = vmax.f32 %v4109_v63, 0.0  ;;  %v3561_v5 = vadd.f32 %v3560_v2, %v3559_v61  ;;  %v3562_v6 = vpop.f32.mrb[26].mxu1 }
 0x753   : > { %3040 = vst [vmem:[%s4704_s21 + $0x10] sm:$0xff] %v3026_v0  ;;  %v3033_v8 = vmin.f32 %v3019_v1, 1.0  ;;  %v3563_v10 = vpop.f32.mrb[27].mxu1 }
 0x754   : > { %3041 = vst [vmem:[%s4704_s21 + $0x18] sm:$0xff] %v3027_v3  ;;  %v3034_v11 = vmin.f32 %v3020_v4, 1.0  ;;  %v2934_v12 = vadd.f32 %v3561_v5, %v2186_v62  ;;  %v3564_v14 = vadd.f32 %v3563_v10, %v3562_v6 }
 0x755   : > { %3047 = vst [vmem:[%s4704_s21 + $0x48] sm:$0xff] %v3033_v8 }
 0x756   : > { %3048 = vst [vmem:[%s4704_s21 + $0x50] sm:$0xff] %v3034_v11  ;;  %v2946_v13 = vsub.f32 0.0, %v2934_v12  ;;  %v2937_v15 = vadd.f32 %v3564_v14, %v2186_v62 }
 0x758   : > { %v2966_v16 = vmul.f32 1.442695, %v2946_v13  ;;  %v2953_v17 = vsub.f32 0.0, %v2937_v15 }
 0x75a   : > { %4110 = vpow2.f32 %v2966_v16  ;;  %v2980_v18 = vmul.f32 1.442695, %v2953_v17 }
 0x75c   : > { %4112 = vpow2.f32 %v2980_v18 }
 0x764   : > { %v4111_v19 = vpop.eup %4110 }
 0x765   : > { %v2988_v20 = vadd.f32 1.0, %v4111_v19 }
 0x766   : > { %v4113_v23 = vpop.eup %4112 }
 0x767   : > { %4114 = vrcp.f32 %v2988_v20  ;;  %v2995_v58 = vadd.f32 1.0, %v4113_v23 }
 0x769   : > { %4116 = vrcp.f32 %v2995_v58 }
 0x771   : > { %v4115_v24 = vpop.eup %4114 }
 0x772   : > { %v3016_v25 = vmax.f32 %v4115_v24, 0.0 }
 0x773   : > { %v4117_v26 = vpop.eup %4116 }
 0x774   : > { %v3030_v27 = vmin.f32 %v3016_v25, 1.0  ;;  %v3023_v28 = vmax.f32 %v4117_v26, 0.0 }
 0x776   : > { %3044 = vst [vmem:[%s4704_s21 + $0x30] sm:$0xff] %v3030_v27  ;;  %v3037_v29 = vmin.f32 %v3023_v28, 1.0 }
 0x778   : > { %3051 = vst [vmem:[%s4704_s21 + $0x68] sm:$0xff] %v3037_v29 }
 0x779   : > { %4187 = shalt.err (!%p4184_p11)
}
 0x77a   : > { %s4188_s20 = scalar_lea.hbm %s4732_s17, 1792  ;;  %s4192_s21 = scalar_lea.hbm %s4828_s25, 3584 }
 0x77b   : > { %p4189_p13 = scmp.ne.s32.totalorder %s4732_s17, %s4188_s20  ;;  %p4193_p6 = scmp.lt.u32.totalorder %s4732_s17, %s4828_s25 }
 0x77c   : > { %p4194_p9 = scmp.lt.u32.totalorder %s4192_s21, %s4188_s20  ;;  %p4196_p10 = scmp.lt.u32.totalorder %s4188_s20, %s4732_s17 }
 0x77d   : > { %p4190_p0 = pnand %p4189_p13, %p4829_p1 }
 0x77e   : > { %p4195_p12 = por %p4194_p9, %p4193_p6 }
 0x77f   : > { %p4191_p5 = pneg %p4190_p0 }
 0x780   : > { %p4197_p2 = por %p4196_p10, %p4195_p12 }
 0x782   : > { %p4198_p3 = pnand %p4197_p2, %p4191_p5 }
 0x784   : > { %4201 = shalt.err (!%p4198_p3)
}
 0x785   : > { %s4258_s30 = smov 896   ;;  %s4259_s22 = smov 56  }
 0x786   : > { %3620 = dma.vmem_to_hbm [thread:$0]  (%p4829_p1), %s4726_s16, 1792, %s4732_s17, %s4737_s26, %s4258_s30, %s4258_s30, %s4259_s22  }
 0x787 PF: > { %s4830_s14 = sld [smem:[#allocation14_spill]]  ;;  %s4831_s19 = sld [smem:[#allocation11_spill]] }
 0x788   : > { %s4832_s28 = sld [smem:[#allocation18_spill]] }
 0x78d   : > { %p3637_p4 = scmp.ge.s32.totalorder %s4830_s14, 2  ;;  %s3091_s23 = sand.u32 1, %s4831_s19  }
 0x78e   : > { %p4833_p7 = scmp.ne.s32.totalorder %s4832_s28, 0  ;;  %s3092_s20 = scalar_lea.sflag [#allocation4], %s3091_s23 }
 0x790   : > { %p3630_p8 = pnand %p3637_p4, %p4833_p7 }
 0x792   : > { %4227 = dma.done.wait (!%p3630_p8), %s3092_s20, 1792  }
 0x793   : > { %4229 = vsyncadd (!%p3630_p8), %s3092_s20, 4294965504  ;;  %s4834_s21 = sld [smem:[#allocation15_spill]]  ;;  %s4835_s18 = sld [smem:[#allocation12_spill]] }
 0x794   : > { %s4836_s19 = sld [smem:[#allocation13_spill]]  ;;  %s4837_s20 = sld [smem:[#allocation16_spill]] }
 0x799   : > { %p28_p11 = scmp.ge.s32.totalorder %s4834_s21, 4  }
 0x79b   :  { %30 = sbr.rel (!%p28_p11) target bundleno = 7 (0x7), region = 141 }
 0x7a2   :  { %3105 = vsyncpa [#allocation3], 1 }
 0x7a3   :  { %3107 = vsyncpa [#allocation3 + $0x1], 1 }
 0x7a4   :  { %3108 = vsyncpa [#allocation6], 1 }
 0x7a5   :  { %3109 = vsyncpa [#allocation4], 1 }
 0x7a6   :  { %3111 = vsyncpa [#allocation4 + $0x1], 1 }

</bundles_post_ra>
